<compile_context>
chip_gen: v7x
topology: tpu7x:2x2x1
jax: 0.10.0
libtpu: 0.0.40
codegen_flags: <defaults>
</compile_context>

<pallas_src>
import functools

import jax
import jax.numpy as jnp
from jax.experimental import pallas as pl
from jax.experimental.pallas import tpu as pltpu

IN_DIM = 28 * 28          # 784  (kept un-padded: ceil(784/128) == ceil(896/128) MXU K-tiles)
HID = 512
OUT_DIM = 10
OUT_PAD = 128             # lane-dense logits / output tile
NEG_INF = -1e30           # pad-logit bias so exp(pad) == 0 in the softmax sum


def mlp_kernel(x_ref, w1_ref, b1_ref, w2_ref, b2_ref, w3_ref, b3_ref, o_ref):
    # In-kernel bf16 cast of the x tile (cheap VPU op; avoids a wrapper HBM pass).
    x = x_ref[...].astype(jnp.bfloat16)

    # ---- hidden = relu(x @ W1 + b1) ----  (bf16 operands, f32 MXU accumulate)
    h = jnp.dot(x, w1_ref[...], preferred_element_type=jnp.float32)
    h = jnp.maximum(h + b1_ref[...], 0.0)

    # ---- hidden_new = relu(h @ W2 + b2) ----
    h = jnp.dot(h.astype(w2_ref.dtype), w2_ref[...],
                preferred_element_type=jnp.float32)
    h = jnp.maximum(h + b2_ref[...], 0.0)

    # ---- logits = h @ W3 + b3 ----  (padded output lanes get b3 = -1e30)
    logits = jnp.dot(h.astype(w3_ref.dtype), w3_ref[...],
                     preferred_element_type=jnp.float32)
    logits = logits + b3_ref[...]

    # ---- log_softmax over dim=1 (last axis), all in f32 ----
    m = jnp.max(logits, axis=-1, keepdims=True)
    shifted = logits - m
    lse = jnp.log(jnp.sum(jnp.exp(shifted), axis=-1, keepdims=True))
    o_ref[...] = (shifted - lse).astype(o_ref.dtype)


def _round_up(x, m):
    return ((x + m - 1) // m) * m


def _num_tensorcores():
    """2 for v7x (megacore), 1 for v5e/v6e (and a safe default elsewhere)."""
    try:
        kind = jax.devices()[0].device_kind.lower()
    except Exception:
        return 1
    return 2 if "7" in kind else 1


_NUM_TC = _num_tensorcores()


def _pick_block_b(batch, num_tc):
    """Rows per grid step (generation-aware)."""
    batch8 = _round_up(max(batch, 1), 8)
    if num_tc <= 1:
        # v5e / v6e: single TensorCore -> fewest grid steps, big M tiles.
        return batch8 if batch8 <= 1024 else 512
    # v7x megacore: even step count, >=128 (>=256 at large B) rows per step.
    if batch8 <= 256:
        return batch8                       # single small step; megacore moot
    per_core = 256 if batch8 >= 2048 else 128
    steps = 2 * ((batch8 + 2 * per_core - 1) // (2 * per_core))   # even
    return _round_up((batch8 + steps - 1) // steps, 8)


def prepare_params(w1, b1, w2, b2, w3, b3):
    """One-time param prep: weights (in, out) cast to bf16; layer-3 padded to 128
    output columns.  Biases stay f32 (elementwise path); padded b3 lanes are -1e30
    so the padded logits vanish from the softmax."""
    w3p = jnp.zeros((HID, OUT_PAD), jnp.float32).at[:, :OUT_DIM].set(
        jnp.asarray(w3, jnp.float32))
    b3p = jnp.full((1, OUT_PAD), NEG_INF, jnp.float32).at[:, :OUT_DIM].set(
        jnp.asarray(b3, jnp.float32).reshape(1, OUT_DIM))
    return (
        jnp.asarray(w1, jnp.float32).astype(jnp.bfloat16),   # (784, 512)
        jnp.asarray(b1, jnp.float32).reshape(1, HID),
        jnp.asarray(w2, jnp.float32).astype(jnp.bfloat16),   # (512, 512)
        jnp.asarray(b2, jnp.float32).reshape(1, HID),
        w3p.astype(jnp.bfloat16),                            # (512, 128)
        b3p,                                                 # (1, 128)
    )


@functools.partial(jax.jit, static_argnames=("block_b",))
def neural_net_forward(x, w1, b1, w2, b2, w3, b3, *, block_b=None):
    """x: (B, 784) float32.  Weights/biases as produced by prepare_params()."""
    B = x.shape[0]
    if block_b is None:
        block_b = _pick_block_b(B, _NUM_TC)
    B_pad = _round_up(B, block_b)

    # Only the batch dim is padded, and only when needed (no feature-dim pad,
    # no wrapper dtype cast -> no extra HBM pass over x).
    xp = x if B_pad == B else jnp.pad(x, ((0, B_pad - B), (0, 0)))

    num_steps = B_pad // block_b
    x_buffers = 3 if num_steps >= 3 else 2   # deeper x buffering hides weight DMA

    grid = (num_steps,)

    # Weights/biases never change across the grid: constant index_map + a single
    # VMEM buffer (no pointless double-buffer DMA / VMEM).
    def resident(shape):
        return pl.BlockSpec(shape, lambda i: (0, 0), pipeline_mode=pl.Buffered(1))

    out = pl.pallas_call(
        mlp_kernel,
        out_shape=jax.ShapeDtypeStruct((B_pad, OUT_PAD), jnp.float32),
        grid_spec=pltpu.PrefetchScalarGridSpec(
            num_scalar_prefetch=0,
            grid=grid,
            in_specs=[
                pl.BlockSpec((block_b, IN_DIM), lambda i: (i, 0),
                             pipeline_mode=pl.Buffered(x_buffers)),  # x tile (f32)
                resident((IN_DIM, HID)),                             # W1 (bf16)
                resident((1, HID)),                                  # b1 (f32)
                resident((HID, HID)),                                # W2 (bf16)
                resident((1, HID)),                                  # b2 (f32)
                resident((HID, OUT_PAD)),                            # W3 (bf16)
                resident((1, OUT_PAD)),                              # b3 (f32, pad=-1e30)
            ],
            out_specs=pl.BlockSpec((block_b, OUT_PAD), lambda i: (i, 0)),
        ),
        compiler_params=pltpu.CompilerParams(
            dimension_semantics=("parallel",),
        ),
    )(xp, w1, b1, w2, b2, w3, b3)

    # TODO(synk): consumers that can take the (B_pad, 128) padded buffer directly
    # save this small slice pass.
    return out[:B, :OUT_DIM]


def init_params(key):
    """Deterministic init mirroring nn.Linear (stored as (in, out)), kept in f32."""
    k1, k2, k3, k4, k5, k6 = jax.random.split(key, 6)

    def lin(kw, kb, fan_in, fan_out):
        bound = 1.0 / jnp.sqrt(fan_in)
        w = jax.random.uniform(kw, (fan_in, fan_out), jnp.float32, -bound, bound)
        b = jax.random.uniform(kb, (1, fan_out), jnp.float32, -bound, bound)
        return w, b

    w1, b1 = lin(k1, k2, IN_DIM, HID)
    w2, b2 = lin(k3, k4, HID, HID)
    w3, b3 = lin(k5, k6, HID, OUT_DIM)
    return w1, b1, w2, b2, w3, b3


def reference_forward_f32(x, w1, b1, w2, b2, w3, b3):
    """Pure f32 reference (PyTorch semantics)."""
    h = jnp.maximum(x @ w1 + b1, 0.0)
    h = jnp.maximum(h @ w2 + b2, 0.0)
    return jax.nn.log_softmax(h @ w3 + b3, axis=1)


def reference_forward_bf16(x, w1, b1, w2, b2, w3, b3):
    """Same bf16-operand / f32-accumulate scheme as the kernel."""
    bf = lambda a: a.astype(jnp.bfloat16).astype(jnp.float32)
    dot = functools.partial(jnp.dot, precision=jax.lax.Precision.HIGHEST)
    h = jnp.maximum(dot(bf(x), bf(w1)) + b1, 0.0)
    h = jnp.maximum(dot(bf(h), bf(w2)) + b2, 0.0)
    return jax.nn.log_softmax(dot(bf(h), bf(w3)) + b3, axis=1)


if __name__ == "__main__":
    key = jax.random.PRNGKey(0)
    kx, kp = jax.random.split(key)

    params_f32 = init_params(kp)
    params = prepare_params(*params_f32)

    # Small deterministic example consistent with the module's (B, 784) input.
    B = 16
    x = jax.random.normal(kx, (B, IN_DIM), jnp.float32)

    out = neural_net_forward(x, *params)
    out = jax.block_until_ready(out)
    assert out.shape == (B, OUT_DIM)

    # Tight check against the same bf16-operand / f32-accumulate math.
    ref_bf16 = reference_forward_bf16(x, *params_f32)
    assert jnp.allclose(out, ref_bf16, atol=1e-2, rtol=1e-2), (
        "max |diff| vs bf16 ref = %g" % float(jnp.max(jnp.abs(out - ref_bf16))))

    # Loose check against the pure-f32 PyTorch semantics (bf16 operand rounding).
    ref_f32 = reference_forward_f32(x, *params_f32)
    assert jnp.allclose(out, ref_f32, atol=5e-2, rtol=5e-2), (
        "max |diff| vs f32 ref = %g" % float(jnp.max(jnp.abs(out - ref_f32))))

    # Second small case with a batch that is not a tile multiple (exercises the
    # batch-only padding path).
    B2 = 20
    x2 = jax.random.normal(jax.random.PRNGKey(1), (B2, IN_DIM), jnp.float32)
    out2 = jax.block_until_ready(neural_net_forward(x2, *params))
    ref2 = reference_forward_f32(x2, *params_f32)
    assert out2.shape == (B2, OUT_DIM)
    assert jnp.allclose(out2, ref2, atol=5e-2, rtol=5e-2), (
        "max |diff| vs f32 ref (B=20) = %g" % float(jnp.max(jnp.abs(out2 - ref2))))

    print("KERNEL_OK")
</pallas_src>

<mosaic_0001>
module attributes {stable_mosaic.version = 11 : i64} {
  func.func @mlp_kernel(%arg0: i32, %arg1: memref<16x784xf32, #tpu.memory_space<vmem>>, %arg2: memref<784x512xbf16, #tpu.memory_space<vmem>>, %arg3: memref<1x512xf32, #tpu.memory_space<vmem>>, %arg4: memref<512x512xbf16, #tpu.memory_space<vmem>>, %arg5: memref<1x512xf32, #tpu.memory_space<vmem>>, %arg6: memref<512x128xbf16, #tpu.memory_space<vmem>>, %arg7: memref<1x128xf32, #tpu.memory_space<vmem>>, %arg8: memref<16x128xf32, #tpu.memory_space<vmem>>) attributes {dimension_semantics = [#tpu.dimension_semantics<parallel>], iteration_bounds = array<i64: 1>, scalar_prefetch = 0 : i64, scratch_operands = 0 : i64, tpu.core_type = #tpu.core_type<tc>, window_params = [{pipeline_mode = #tpu.pipeline_mode<double_buffered>, transform_indices = @transform_0, window_bounds = array<i64: 16, 784>}, {pipeline_mode = #tpu.pipeline_mode<synchronous>, transform_indices = @transform_1, window_bounds = array<i64: 784, 512>}, {pipeline_mode = #tpu.pipeline_mode<synchronous>, transform_indices = @transform_2, window_bounds = array<i64: 1, 512>}, {pipeline_mode = #tpu.pipeline_mode<synchronous>, transform_indices = @transform_3, window_bounds = array<i64: 512, 512>}, {pipeline_mode = #tpu.pipeline_mode<synchronous>, transform_indices = @transform_4, window_bounds = array<i64: 1, 512>}, {pipeline_mode = #tpu.pipeline_mode<synchronous>, transform_indices = @transform_5, window_bounds = array<i64: 512, 128>}, {pipeline_mode = #tpu.pipeline_mode<synchronous>, transform_indices = @transform_6, window_bounds = array<i64: 1, 128>}, {transform_indices = @transform_7, window_bounds = array<i64: 16, 128>}]} {
    %c0 = arith.constant 0 : index
    %c0_0 = arith.constant 0 : index
    %0 = vector.load %arg1[%c0, %c0_0] : memref<16x784xf32, #tpu.memory_space<vmem>>, vector<16x784xf32>
    %1 = arith.truncf %0 : vector<16x784xf32> to vector<16x784xbf16>
    %c0_1 = arith.constant 0 : index
    %c0_2 = arith.constant 0 : index
    %2 = vector.load %arg2[%c0_1, %c0_2] : memref<784x512xbf16, #tpu.memory_space<vmem>>, vector<784x512xbf16>
    %cst = arith.constant dense<0.000000e+00> : vector<16x512xf32>
    %3 = tpu.matmul %1, %2, %cst {dimension_numbers = #tpu.dot_dimension_numbers<[1], [0], [0], [1], [0, 0, 1, 1], [], []>} : vector<16x784xbf16>, vector<784x512xbf16>, vector<16x512xf32> -> vector<16x512xf32>
    %c0_3 = arith.constant 0 : index
    %c0_4 = arith.constant 0 : index
    %4 = vector.load %arg3[%c0_3, %c0_4] : memref<1x512xf32, #tpu.memory_space<vmem>>, vector<1x512xf32>
    %5 = vector.broadcast %4 : vector<1x512xf32> to vector<16x512xf32>
    %6 = arith.addf %3, %5 : vector<16x512xf32>
    %cst_5 = arith.constant 0.000000e+00 : f32
    %7 = vector.broadcast %cst_5 : f32 to vector<16x512xf32>
    %8 = arith.maximumf %6, %7 : vector<16x512xf32>
    %9 = arith.truncf %8 : vector<16x512xf32> to vector<16x512xbf16>
    %c0_6 = arith.constant 0 : index
    %c0_7 = arith.constant 0 : index
    %10 = vector.load %arg4[%c0_6, %c0_7] : memref<512x512xbf16, #tpu.memory_space<vmem>>, vector<512x512xbf16>
    %cst_8 = arith.constant dense<0.000000e+00> : vector<16x512xf32>
    %11 = tpu.matmul %9, %10, %cst_8 {dimension_numbers = #tpu.dot_dimension_numbers<[1], [0], [0], [1], [0, 0, 1, 1], [], []>} : vector<16x512xbf16>, vector<512x512xbf16>, vector<16x512xf32> -> vector<16x512xf32>
    %c0_9 = arith.constant 0 : index
    %c0_10 = arith.constant 0 : index
    %12 = vector.load %arg5[%c0_9, %c0_10] : memref<1x512xf32, #tpu.memory_space<vmem>>, vector<1x512xf32>
    %13 = vector.broadcast %12 : vector<1x512xf32> to vector<16x512xf32>
    %14 = arith.addf %11, %13 : vector<16x512xf32>
    %cst_11 = arith.constant 0.000000e+00 : f32
    %15 = vector.broadcast %cst_11 : f32 to vector<16x512xf32>
    %16 = arith.maximumf %14, %15 : vector<16x512xf32>
    %17 = arith.truncf %16 : vector<16x512xf32> to vector<16x512xbf16>
    %c0_12 = arith.constant 0 : index
    %c0_13 = arith.constant 0 : index
    %18 = vector.load %arg6[%c0_12, %c0_13] : memref<512x128xbf16, #tpu.memory_space<vmem>>, vector<512x128xbf16>
    %cst_14 = arith.constant dense<0.000000e+00> : vector<16x128xf32>
    %19 = tpu.matmul %17, %18, %cst_14 {dimension_numbers = #tpu.dot_dimension_numbers<[1], [0], [0], [1], [0, 0, 1, 1], [], []>} : vector<16x512xbf16>, vector<512x128xbf16>, vector<16x128xf32> -> vector<16x128xf32>
    %c0_15 = arith.constant 0 : index
    %c0_16 = arith.constant 0 : index
    %20 = vector.load %arg7[%c0_15, %c0_16] : memref<1x128xf32, #tpu.memory_space<vmem>>, vector<1x128xf32>
    %21 = vector.broadcast %20 : vector<1x128xf32> to vector<16x128xf32>
    %22 = arith.addf %19, %21 : vector<16x128xf32>
    %cst_17 = arith.constant dense<0xFF800000> : vector<16xf32>
    %23 = vector.multi_reduction <maximumf>, %22, %cst_17 [1] : vector<16x128xf32> to vector<16xf32>
    %24 = vector.shape_cast %23 : vector<16xf32> to vector<16x1xf32>
    %25 = vector.broadcast %24 : vector<16x1xf32> to vector<16x128xf32>
    %26 = arith.subf %22, %25 : vector<16x128xf32>
    %27 = math.exp %26 : vector<16x128xf32>
    %cst_18 = arith.constant dense<0.000000e+00> : vector<16xf32>
    %28 = vector.multi_reduction <add>, %27, %cst_18 [1] : vector<16x128xf32> to vector<16xf32>
    %29 = vector.shape_cast %28 : vector<16xf32> to vector<16x1xf32>
    %30 = math.log %29 : vector<16x1xf32>
    %31 = vector.broadcast %30 : vector<16x1xf32> to vector<16x128xf32>
    %32 = arith.subf %26, %31 : vector<16x128xf32>
    %c0_19 = arith.constant 0 : index
    %c0_20 = arith.constant 0 : index
    %33 = vector.load %arg8[%c0_19, %c0_20] : memref<16x128xf32, #tpu.memory_space<vmem>>, vector<16x128xf32>
    tpu.vector_store %arg8[%c0_19, %c0_20], %32 {strides = array<i32>} : memref<16x128xf32, #tpu.memory_space<vmem>>, vector<16x128xf32>,
    return
  }
  func.func @transform_0(%arg0: i32) -> (i32, i32) {
    %c0_i32 = arith.constant 0 : i32
    %c0_i32_0 = arith.constant 0 : i32
    return %arg0, %c0_i32 : i32, i32
  }
  func.func @transform_1(%arg0: i32) -> (i32, i32) {
    %c0_i32 = arith.constant 0 : i32
    %c0_i32_0 = arith.constant 0 : i32
    %c0_i32_1 = arith.constant 0 : i32
    return %c0_i32, %c0_i32_0 : i32, i32
  }
  func.func @transform_2(%arg0: i32) -> (i32, i32) {
    %c0_i32 = arith.constant 0 : i32
    %c0_i32_0 = arith.constant 0 : i32
    %c0_i32_1 = arith.constant 0 : i32
    return %c0_i32, %c0_i32_0 : i32, i32
  }
  func.func @transform_3(%arg0: i32) -> (i32, i32) {
    %c0_i32 = arith.constant 0 : i32
    %c0_i32_0 = arith.constant 0 : i32
    %c0_i32_1 = arith.constant 0 : i32
    return %c0_i32, %c0_i32_0 : i32, i32
  }
  func.func @transform_4(%arg0: i32) -> (i32, i32) {
    %c0_i32 = arith.constant 0 : i32
    %c0_i32_0 = arith.constant 0 : i32
    %c0_i32_1 = arith.constant 0 : i32
    return %c0_i32, %c0_i32_0 : i32, i32
  }
  func.func @transform_5(%arg0: i32) -> (i32, i32) {
    %c0_i32 = arith.constant 0 : i32
    %c0_i32_0 = arith.constant 0 : i32
    %c0_i32_1 = arith.constant 0 : i32
    return %c0_i32, %c0_i32_0 : i32, i32
  }
  func.func @transform_6(%arg0: i32) -> (i32, i32) {
    %c0_i32 = arith.constant 0 : i32
    %c0_i32_0 = arith.constant 0 : i32
    %c0_i32_1 = arith.constant 0 : i32
    return %c0_i32, %c0_i32_0 : i32, i32
  }
  func.func @transform_7(%arg0: i32) -> (i32, i32) {
    %c0_i32 = arith.constant 0 : i32
    %c0_i32_0 = arith.constant 0 : i32
    return %arg0, %c0_i32 : i32, i32
  }
}

</mosaic_0001>

<bundles_post_ra>
// kernel: neural_net_forward.1
= control target key start
LH: loop header
LB: loop body
LE: loop exit
PB: predicated region body
PF: predicated region fallthrough
CT: control target
= control target key end

     0   :  { %12 = vsyncpa [#allocation3], 0  ;;  %s4295_s0 = inlined_call_operand.hbm [shape: f32[16,784], index: 0, kind: input, shape index: {}]   ;;  %s4296_s1 = inlined_call_operand.hbm [shape: bf16[784,512], index: 1, kind: input, shape index: {}]   ;;  %s4297_s2 = inlined_call_operand.vmem [shape: f32[1,512], index: 2, kind: input, shape index: {}]   ;;  %s4298_s3 = inlined_call_operand.hbm [shape: bf16[512,512], index: 3, kind: input, shape index: {}]   ;;  %s4299_s4 = inlined_call_operand.vmem [shape: f32[1,512], index: 4, kind: input, shape index: {}]   ;;  %s4300_s5 = inlined_call_operand.hbm [shape: bf16[512,128], index: 5, kind: input, shape index: {}]   ;;  %s4301_s6 = inlined_call_operand.vmem [shape: f32[1,128], index: 6, kind: input, shape index: {}]   ;;  %s4302_s7 = inlined_call_operand.hbm [shape: f32[16,128], index: 7, kind: output, shape index: {}]  }
   0x1   :  { %13 = vsyncpa [#allocation6], 0 }
   0x2   :  { %14 = vsyncpa [#allocation9], 0 }
   0x3   :  { %15 = vsyncpa [#allocation4], 0  ;;  %s4131_s24 = smov [#allocation5]   ;;  %s4013_s28 = scalar_lea.hbm %s4296_s1, 25088 }
   0x4   :  { %s33_s25 = sshll.u32 %s4131_s24, 4  ;;  %p4014_p0 = scmp.ne.s32.totalorder %s4296_s1, %s4013_s28  ;;  %s34_s25 = int_to_ptr.vmem [resolvable:$true] %s33_s25 }
   0x5   :  { %p4017_p1 = scmp.lt.u32.totalorder %s4013_s28, %s4296_s1 }
   0x7   :  { %p4019_p2 = pnand %p4017_p1, %p4014_p0 }
   0x9   :  { %4022 = shalt.err (!%p4019_p2)
}
   0xa   :  { %s4023_s10 = scalar_lea.vmem %s34_s25, 25088  ;;  %p4028_p4 = scmp.lt.s32.totalorder %s34_s25, %s34_s25 }
   0xb   :  { %p4024_p3 = scmp.ne.s32.totalorder %s34_s25, %s4023_s10  ;;  %p4029_p5 = scmp.lt.s32.totalorder %s4023_s10, %s4023_s10 }
   0xd   :  { %p4030_p6 = por %p4029_p5, %p4028_p4 }
   0xf   :  { %p4031_p7 = pnand %p4030_p6, %p4024_p3 }
  0x11   :  { %4034 = shalt.err (!%p4031_p7)
}
  0x12   :  { %s4132_s11 = smov 256   ;;  %s4133_s12 = smov 16  }
  0x13   :  { %39 = dma.hbm_to_vmem [thread:$0]  %s4296_s1, 25088, %s34_s25, [#allocation6], %s4132_s11, %s4132_s11, %s4133_s12  }
  0x14   :  { %s4134_s15 = smov [#allocation2]   ;;  %s4035_s19 = scalar_lea.hbm %s4295_s0, 1792 }
  0x15   :  { %s21_s16 = sshll.u32 %s4134_s15, 4  ;;  %p4036_p8 = scmp.ne.s32.totalorder %s4295_s0, %s4035_s19  ;;  %s22_s16 = int_to_ptr.vmem [resolvable:$true] %s21_s16 }
  0x16   :  { %p4039_p9 = scmp.lt.u32.totalorder %s4035_s19, %s4295_s0 }
  0x18   :  { %p4041_p10 = pnand %p4039_p9, %p4036_p8 }
  0x1a   :  { %4044 = shalt.err (!%p4041_p10)
}
  0x1b   :  { %s4045_s24 = scalar_lea.vmem %s22_s16, 1792  ;;  %p4050_p12 = scmp.lt.s32.totalorder %s22_s16, %s22_s16 }
  0x1c   :  { %p4046_p11 = scmp.ne.s32.totalorder %s22_s16, %s4045_s24  ;;  %p4051_p13 = scmp.lt.s32.totalorder %s4045_s24, %s4045_s24 }
  0x1e   :  { %p4052_p0 = por %p4051_p13, %p4050_p12 }
  0x20   :  { %p4053_p1 = pnand %p4052_p0, %p4046_p11 }
  0x22   :  { %4056 = shalt.err (!%p4053_p1)
}
  0x23   :  { %s4135_s1 = smov 896   ;;  %s4136_s25 = smov 56  }
  0x24   :  { %27 = dma.hbm_to_vmem [thread:$0]  %s4295_s0, 1792, %s22_s16, [#allocation3], %s4135_s1, %s4135_s1, %s4136_s25  }
  0x25   :  { %s4137_s28 = smov [#allocation7]   ;;  %s4138_s30 = smov [#allocation8]  }
  0x26   :  { %s47_s29 = sshll.u32 %s4137_s28, 4  ;;  %s61_s8 = sshll.u32 %s4138_s30, 4  ;;  %s48_s29 = int_to_ptr.vmem [resolvable:$true] %s47_s29  ;;  %s4212_s8 = int_to_ptr.vmem [resolvable:$true] %s61_s8 }
  0x27   :  { %s4057_s13 = scalar_lea.hbm %s4298_s3, 16384 }
  0x28   :  { %p4058_p2 = scmp.ne.s32.totalorder %s4298_s3, %s4057_s13  ;;  %p4061_p3 = scmp.lt.u32.totalorder %s4057_s13, %s4298_s3 }
  0x2a   :  { %p4063_p4 = pnand %p4061_p3, %p4058_p2 }
  0x2c   :  { %4066 = shalt.err (!%p4063_p4)
}
  0x2d   :  { %s4067_s0 = scalar_lea.vmem %s48_s29, 16384  ;;  %p4072_p6 = scmp.lt.s32.totalorder %s48_s29, %s48_s29 }
  0x2e   :  { %p4068_p5 = scmp.ne.s32.totalorder %s48_s29, %s4067_s0  ;;  %p4073_p7 = scmp.lt.s32.totalorder %s4067_s0, %s4067_s0 }
  0x30   :  { %p4074_p8 = por %p4073_p7, %p4072_p6 }
  0x32   :  { %p4075_p9 = pnand %p4074_p8, %p4068_p5 }
  0x34   :  { %4078 = shalt.err (!%p4075_p9)
}
  0x35   :  { %53 = dma.hbm_to_vmem [thread:$0]  %s4298_s3, 16384, %s48_s29, [#allocation6], %s4132_s11, %s4132_s11, %s4133_s12  }
  0x36   :  { %s4079_s22 = scalar_lea.hbm %s4300_s5, 4096 }
  0x37   :  { %p4080_p10 = scmp.ne.s32.totalorder %s4300_s5, %s4079_s22  ;;  %p4083_p11 = scmp.lt.u32.totalorder %s4079_s22, %s4300_s5 }
  0x39   :  { %p4085_p12 = pnand %p4083_p11, %p4080_p10 }
  0x3b   :  { %4088 = shalt.err (!%p4085_p12)
}
  0x3c   :  { %s4089_s26 = scalar_lea.vmem %s4212_s8, 4096  ;;  %p4094_p0 = scmp.lt.s32.totalorder %s4212_s8, %s4212_s8 }
  0x3d   :  { %p4090_p13 = scmp.ne.s32.totalorder %s4212_s8, %s4089_s26  ;;  %p4095_p1 = scmp.lt.s32.totalorder %s4089_s26, %s4089_s26 }
  0x3f   :  { %p4096_p2 = por %p4095_p1, %p4094_p0 }
  0x41   :  { %p4097_p3 = pnand %p4096_p2, %p4090_p13 }
  0x43   :  { %4100 = shalt.err (!%p4097_p3)
}
  0x44   :  { %s4139_s3 = smov 64   ;;  %s4140_s11 = smov 4  }
  0x45   :  { %67 = dma.hbm_to_vmem [thread:$0]  %s4300_s5, 4096, %s4212_s8, [#allocation9], %s4139_s3, %s4139_s3, %s4140_s11  }
  0x46   :  { %4123 = dma.done.wait [#allocation3], 1792  }
  0x47   :  { %4124 = vsyncadd [#allocation3], 4294965504 }
  0x48   :  { %4125 = dma.done.wait [#allocation6], 41472  }
  0x49   :  { %4126 = vsyncadd [#allocation6], 4294925824 }
  0x4a   :  { %4127 = dma.done.wait [#allocation9], 4096  }
  0x4b   :  { %4128 = vsyncadd [#allocation9], 4294963200  ;;  %v3487_v0 = vld [vmem:[#allocation5 + $0x4] ss:$16 sps:$4 sm:$0xff]   ;;  %v3489_v1 = vld [vmem:[#allocation5 + $0xc] ss:$16 sps:$4 sm:$0xff]  }
  0x4c   :  { %1306 = vmatprep.subr.bf16.mxu0 %v3487_v0  ;;  %v3491_v2 = vld [vmem:[#allocation5] ss:$16 sps:$4 sm:$0xff]   ;;  %v3492_v3 = vld [vmem:[#allocation5 + $0x8] ss:$16 sps:$4 sm:$0xff]   ;;  %1478 = vmatprep.subr.bf16.mxu1 %v3489_v1  ;;  %v3493_v4 = vld [vmem:[#allocation5 + $0x24] ss:$16 sps:$4 sm:$0xff]  }
  0x4d   :  { %1307 = vmatpush1.bf16.msra.mxu0 %v3491_v2  ;;  %1479 = vmatpush1.bf16.msra.mxu1 %v3492_v3  ;;  %v3495_v5 = vld [vmem:[#allocation5 + $0x2c] ss:$16 sps:$4 sm:$0xff]   ;;  %v3497_v6 = vld [vmem:[#allocation5 + $0x20] ss:$16 sps:$4 sm:$0xff]   ;;  %v3498_v7 = vld [vmem:[#allocation5 + $0x28] ss:$16 sps:$4 sm:$0xff]  }
  0x4e   :  { %1308 = vmatprep.subr.bf16.mxu0 %v3493_v4  ;;  %1480 = vmatprep.subr.bf16.mxu1 %v3495_v5  ;;  %v3499_v8 = vld [vmem:[#allocation5 + $0x44] ss:$16 sps:$4 sm:$0xff]   ;;  %v3501_v9 = vld [vmem:[#allocation5 + $0x4c] ss:$16 sps:$4 sm:$0xff]   ;;  %v3503_v10 = vld [vmem:[#allocation5 + $0x40] ss:$16 sps:$4 sm:$0xff]  }
  0x4f   :  { %v3504_v11 = vld [vmem:[#allocation5 + $0x48] ss:$16 sps:$4 sm:$0xff]   ;;  %v3505_v12 = vld [vmem:[#allocation5 + $0x64] ss:$16 sps:$4 sm:$0xff]   ;;  %v3507_v13 = vld [vmem:[#allocation5 + $0x6c] ss:$16 sps:$4 sm:$0xff]  }
  0x50   :  { %v3509_v14 = vld [vmem:[#allocation5 + $0x60] ss:$16 sps:$4 sm:$0xff]   ;;  %v3510_v15 = vld [vmem:[#allocation5 + $0x68] ss:$16 sps:$4 sm:$0xff]   ;;  %v3511_v16 = vld [vmem:[#allocation5 + $0x84] ss:$16 sps:$4 sm:$0xff]  }
  0x51   :  { %1309 = vmatpush1.bf16.msra.mxu0 %v3497_v6  ;;  %1481 = vmatpush1.bf16.msra.mxu1 %v3498_v7  ;;  %v3513_v17 = vld [vmem:[#allocation5 + $0x8c] ss:$16 sps:$4 sm:$0xff]   ;;  %v3515_v18 = vld [vmem:[#allocation5 + $0x80] ss:$16 sps:$4 sm:$0xff]   ;;  %v3516_v19 = vld [vmem:[#allocation5 + $0x88] ss:$16 sps:$4 sm:$0xff]  }
  0x52   :  { %1310 = vmatprep.subr.bf16.mxu0 %v3499_v8  ;;  %1482 = vmatprep.subr.bf16.mxu1 %v3501_v9  ;;  %v3517_v20 = vld [vmem:[#allocation5 + $0xa4] ss:$16 sps:$4 sm:$0xff]   ;;  %v3519_v21 = vld [vmem:[#allocation5 + $0xac] ss:$16 sps:$4 sm:$0xff]   ;;  %v3521_v22 = vld [vmem:[#allocation5 + $0xa0] ss:$16 sps:$4 sm:$0xff]  }
  0x53   :  { %v3522_v23 = vld [vmem:[#allocation5 + $0xa8] ss:$16 sps:$4 sm:$0xff]   ;;  %v3523_v24 = vld [vmem:[#allocation5 + $0xc4] ss:$16 sps:$4 sm:$0xff]   ;;  %v3525_v25 = vld [vmem:[#allocation5 + $0xcc] ss:$16 sps:$4 sm:$0xff]  }
  0x54   :  { %v3527_v26 = vld [vmem:[#allocation5 + $0xc0] ss:$16 sps:$4 sm:$0xff]   ;;  %v3528_v27 = vld [vmem:[#allocation5 + $0xc8] ss:$16 sps:$4 sm:$0xff]   ;;  %v3529_v28 = vld [vmem:[#allocation5 + $0xe4] ss:$16 sps:$4 sm:$0xff]  }
  0x55   :  { %1311 = vmatpush1.bf16.msra.mxu0 %v3503_v10  ;;  %1483 = vmatpush1.bf16.msra.mxu1 %v3504_v11  ;;  %v3531_v29 = vld [vmem:[#allocation5 + $0xec] ss:$16 sps:$4 sm:$0xff]   ;;  %v3533_v30 = vld [vmem:[#allocation5 + $0xe0] ss:$16 sps:$4 sm:$0xff]   ;;  %v3534_v31 = vld [vmem:[#allocation5 + $0xe8] ss:$16 sps:$4 sm:$0xff]  }
  0x56   :  { %1312 = vmatprep.subr.bf16.mxu0 %v3505_v12  ;;  %1484 = vmatprep.subr.bf16.mxu1 %v3507_v13  ;;  %v3535_v32 = vld [vmem:[#allocation5 + $0x104] ss:$16 sps:$4 sm:$0xff]   ;;  %v3537_v33 = vld [vmem:[#allocation5 + $0x10c] ss:$16 sps:$4 sm:$0xff]   ;;  %v3539_v34 = vld [vmem:[#allocation5 + $0x100] ss:$16 sps:$4 sm:$0xff]  }
  0x57   :  { %v3540_v35 = vld [vmem:[#allocation5 + $0x108] ss:$16 sps:$4 sm:$0xff]   ;;  %v3541_v36 = vld [vmem:[#allocation5 + $0x124] ss:$16 sps:$4 sm:$0xff]   ;;  %v3543_v37 = vld [vmem:[#allocation5 + $0x12c] ss:$16 sps:$4 sm:$0xff]  }
  0x58   :  { %v3545_v38 = vld [vmem:[#allocation5 + $0x120] ss:$16 sps:$4 sm:$0xff]   ;;  %v3546_v39 = vld [vmem:[#allocation5 + $0x128] ss:$16 sps:$4 sm:$0xff]   ;;  %v3547_v40 = vld [vmem:[#allocation5 + $0x144] ss:$16 sps:$4 sm:$0xff]  }
  0x59   :  { %1313 = vmatpush1.bf16.msra.mxu0 %v3509_v14  ;;  %1485 = vmatpush1.bf16.msra.mxu1 %v3510_v15  ;;  %v3549_v41 = vld [vmem:[#allocation5 + $0x14c] ss:$16 sps:$4 sm:$0xff]   ;;  %v3551_v42 = vld [vmem:[#allocation5 + $0x140] ss:$16 sps:$4 sm:$0xff]   ;;  %v3552_v43 = vld [vmem:[#allocation5 + $0x148] ss:$16 sps:$4 sm:$0xff]  }
  0x5a   :  { %1314 = vmatprep.subr.bf16.mxu0 %v3511_v16  ;;  %1486 = vmatprep.subr.bf16.mxu1 %v3513_v17  ;;  %v3553_v44 = vld [vmem:[#allocation5 + $0x164] ss:$16 sps:$4 sm:$0xff]   ;;  %v3555_v45 = vld [vmem:[#allocation5 + $0x16c] ss:$16 sps:$4 sm:$0xff]   ;;  %v3557_v48 = vld [vmem:[#allocation5 + $0x160] ss:$16 sps:$4 sm:$0xff]  }
  0x5b   :  { %v84_v46 = vld [vmem:[#allocation2 + $0x8] sm:$0xff]  ;;  %v91_v47 = vld [vmem:[#allocation2 + $0x40] sm:$0xff]  ;;  %v90_v5 = vld [vmem:[#allocation2 + $0x38] sm:$0xff]  ;;  %vm1302_vm0 = vcmask 130048  }
  0x5c   :  { %v3558_v49 = vld [vmem:[#allocation5 + $0x168] ss:$16 sps:$4 sm:$0xff]   ;;  %v98_v50 = vpack.c.bf16 %v91_v47, %v84_v46  ;;  %v3559_v51 = vld [vmem:[#allocation5 + $0x184] ss:$16 sps:$4 sm:$0xff]   ;;  %v3561_v52 = vld [vmem:[#allocation5 + $0x18c] ss:$16 sps:$4 sm:$0xff]  }
  0x5d   :  { %1315 = vmatpush1.bf16.msra.mxu0 %v3515_v18  ;;  %1487 = vmatpush1.bf16.msra.mxu1 %v3516_v19  ;;  %v3563_v53 = vld [vmem:[#allocation5 + $0x180] ss:$16 sps:$4 sm:$0xff]   ;;  %v3564_v54 = vld [vmem:[#allocation5 + $0x188] ss:$16 sps:$4 sm:$0xff]   ;;  %v3565_v55 = vld [vmem:[#allocation5 + $0x1a4] ss:$16 sps:$4 sm:$0xff]  }
  0x5e   :  { %1316 = vmatprep.subr.bf16.mxu0 %v3517_v20  ;;  %1488 = vmatprep.subr.bf16.mxu1 %v3519_v21  ;;  %v3567_v56 = vld [vmem:[#allocation5 + $0x1ac] ss:$16 sps:$4 sm:$0xff]   ;;  %v3569_v57 = vld [vmem:[#allocation5 + $0x1a0] ss:$16 sps:$4 sm:$0xff]   ;;  %v3570_v58 = vld [vmem:[#allocation5 + $0x1a8] ss:$16 sps:$4 sm:$0xff]  }
  0x5f   :  { %1338 = vmatprep.mubr.bf16.mxu0 %v98_v50  ;;  %1510 = vmatprep.mubr.bf16.mxu1 %v98_v50  ;;  %v3571_v59 = vld [vmem:[#allocation5 + $0x1c4] ss:$16 sps:$4 sm:$0xff]   ;;  %v3573_v60 = vld [vmem:[#allocation5 + $0x1cc] ss:$16 sps:$4 sm:$0xff]   ;;  %v3575_v61 = vld [vmem:[#allocation5 + $0x1c0] ss:$16 sps:$4 sm:$0xff]  }
  0x60   :  { %v3576_v62 = vld [vmem:[#allocation5 + $0x1c8] ss:$16 sps:$4 sm:$0xff]   ;;  %v3577_v63 = vld [vmem:[#allocation5 + $0x1e4] ss:$16 sps:$4 sm:$0xff]   ;;  %v3579_v0 = vld [vmem:[#allocation5 + $0x1ec] ss:$16 sps:$4 sm:$0xff]  }
  0x61   :  { %1317 = vmatpush1.bf16.msra.mxu0 %v3521_v22  ;;  %1489 = vmatpush1.bf16.msra.mxu1 %v3522_v23  ;;  %v3581_v1 = vld [vmem:[#allocation5 + $0x1e0] ss:$16 sps:$4 sm:$0xff]   ;;  %v3582_v2 = vld [vmem:[#allocation5 + $0x1e8] ss:$16 sps:$4 sm:$0xff]   ;;  %v3585_v3 = vld [vmem:[#allocation5 + $0x204] ss:$16 sps:$4 sm:$0xff]  }
  0x62   :  { %1318 = vmatprep.subr.bf16.mxu0 %v3523_v24  ;;  %1490 = vmatprep.subr.bf16.mxu1 %v3525_v25  ;;  %v83_v4 = vld [vmem:[#allocation2] sm:$0xff]  ;;  %v3588_v6 = vld [vmem:[#allocation5 + $0x20c] ss:$16 sps:$4 sm:$0xff]   ;;  %v3586_v8 = vld [vmem:[#allocation5 + $0x208] ss:$16 sps:$4 sm:$0xff]  }
  0x63   :  { %v3583_v7 = vld [vmem:[#allocation5 + $0x200] ss:$16 sps:$4 sm:$0xff]   ;;  %v97_v9 = vpack.c.bf16 %v90_v5, %v83_v4  ;;  %v3591_v10 = vld [vmem:[#allocation5 + $0x224] ss:$16 sps:$4 sm:$0xff]   ;;  %v3594_v11 = vld [vmem:[#allocation5 + $0x22c] ss:$16 sps:$4 sm:$0xff]  }
  0x64   :  { %v3589_v12 = vld [vmem:[#allocation5 + $0x220] ss:$16 sps:$4 sm:$0xff]   ;;  %v3592_v13 = vld [vmem:[#allocation5 + $0x228] ss:$16 sps:$4 sm:$0xff]   ;;  %v3597_v14 = vld [vmem:[#allocation5 + $0x244] ss:$16 sps:$4 sm:$0xff]  }
  0x65   :  { %1319 = vmatpush1.bf16.msra.mxu0 %v3527_v26  ;;  %1491 = vmatpush1.bf16.msra.mxu1 %v3528_v27  ;;  %v3600_v15 = vld [vmem:[#allocation5 + $0x24c] ss:$16 sps:$4 sm:$0xff]   ;;  %v3595_v16 = vld [vmem:[#allocation5 + $0x240] ss:$16 sps:$4 sm:$0xff]   ;;  %v3598_v17 = vld [vmem:[#allocation5 + $0x248] ss:$16 sps:$4 sm:$0xff]  }
  0x66   :  { %1320 = vmatprep.subr.bf16.mxu0 %v3529_v28  ;;  %1492 = vmatprep.subr.bf16.mxu1 %v3531_v29  ;;  %v3603_v18 = vld [vmem:[#allocation5 + $0x264] ss:$16 sps:$4 sm:$0xff]   ;;  %v3606_v19 = vld [vmem:[#allocation5 + $0x26c] ss:$16 sps:$4 sm:$0xff]   ;;  %v3601_v20 = vld [vmem:[#allocation5 + $0x260] ss:$16 sps:$4 sm:$0xff]  }
  0x67   :  { %v3604_v21 = vld [vmem:[#allocation5 + $0x268] ss:$16 sps:$4 sm:$0xff]   ;;  %v3609_v22 = vld [vmem:[#allocation5 + $0x284] ss:$16 sps:$4 sm:$0xff]   ;;  %v3612_v23 = vld [vmem:[#allocation5 + $0x28c] ss:$16 sps:$4 sm:$0xff]  }
  0x68   :  { %v3607_v24 = vld [vmem:[#allocation5 + $0x280] ss:$16 sps:$4 sm:$0xff]   ;;  %v3610_v25 = vld [vmem:[#allocation5 + $0x288] ss:$16 sps:$4 sm:$0xff]   ;;  %v3615_v26 = vld [vmem:[#allocation5 + $0x2a4] ss:$16 sps:$4 sm:$0xff]  }
  0x69   :  { %1321 = vmatpush1.bf16.msra.mxu0 %v3533_v30  ;;  %1493 = vmatpush1.bf16.msra.mxu1 %v3534_v31  ;;  %v3618_v27 = vld [vmem:[#allocation5 + $0x2ac] ss:$16 sps:$4 sm:$0xff]   ;;  %v3613_v28 = vld [vmem:[#allocation5 + $0x2a0] ss:$16 sps:$4 sm:$0xff]   ;;  %v3616_v29 = vld [vmem:[#allocation5 + $0x2a8] ss:$16 sps:$4 sm:$0xff]  }
  0x6a   :  { %1322 = vmatprep.subr.bf16.mxu0 %v3535_v32  ;;  %1494 = vmatprep.subr.bf16.mxu1 %v3537_v33  ;;  %v3621_v30 = vld [vmem:[#allocation5 + $0x2c4] ss:$16 sps:$4 sm:$0xff]   ;;  %v3624_v31 = vld [vmem:[#allocation5 + $0x2cc] ss:$16 sps:$4 sm:$0xff]   ;;  %v3637_v47 = vld [vmem:[#allocation5 + $0x320] ss:$16 sps:$4 sm:$0xff]  }
  0x6b   :  { %v86_v32 = vld [vmem:[#allocation2 + $0x18] sm:$0xff]  ;;  %v93_v33 = vld [vmem:[#allocation2 + $0x50] sm:$0xff] }
  0x6c   :  { %v3642_v46 = vld [vmem:[#allocation5 + $0x32c] ss:$16 sps:$4 sm:$0xff]   ;;  %v3670_v4 = vld [vmem:[#allocation5 + $0x3c8] ss:$16 sps:$4 sm:$0xff]   ;;  %v3675_v5 = vld [vmem:[#allocation5 + $0x3e4] ss:$16 sps:$4 sm:$0xff]  }
  0x6d   :  { %1323 = vmatpush1.bf16.msra.mxu0 %v3539_v34  ;;  %1495 = vmatpush1.bf16.msra.mxu1 %v3540_v35  ;;  %v3619_v34 = vld [vmem:[#allocation5 + $0x2c0] ss:$16 sps:$4 sm:$0xff]   ;;  %v3622_v35 = vld [vmem:[#allocation5 + $0x2c8] ss:$16 sps:$4 sm:$0xff]   ;;  %v3648_v50 = vld [vmem:[#allocation5 + $0x34c] ss:$16 sps:$4 sm:$0xff]  }
  0x6e   :  { %1324 = vmatprep.subr.bf16.mxu0 %v3541_v36  ;;  %1496 = vmatprep.subr.bf16.mxu1 %v3543_v37  ;;  %v100_v36 = vpack.c.bf16 %v93_v33, %v86_v32  ;;  %v3627_v37 = vld [vmem:[#allocation5 + $0x2e4] ss:$16 sps:$4 sm:$0xff]   ;;  %v3708_v32 = vld [vmem:[#allocation5 + $0x48c] ss:$16 sps:$4 sm:$0xff]   ;;  %v3703_v33 = vld [vmem:[#allocation5 + $0x480] ss:$16 sps:$4 sm:$0xff]  }
  0x71   :  { %1325 = vmatpush1.bf16.msra.mxu0 %v3545_v38  ;;  %1497 = vmatpush1.bf16.msra.mxu1 %v3546_v39  ;;  %v3630_v38 = vld [vmem:[#allocation5 + $0x2ec] ss:$16 sps:$4 sm:$0xff]   ;;  %v3625_v39 = vld [vmem:[#allocation5 + $0x2e0] ss:$16 sps:$4 sm:$0xff]  }
  0x72   :  { %1326 = vmatprep.subr.bf16.mxu0 %v3547_v40  ;;  %1498 = vmatprep.subr.bf16.mxu1 %v3549_v41  ;;  %v3628_v40 = vld [vmem:[#allocation5 + $0x2e8] ss:$16 sps:$4 sm:$0xff]   ;;  %v3633_v41 = vld [vmem:[#allocation5 + $0x304] ss:$16 sps:$4 sm:$0xff]  }
  0x75   :  { %1327 = vmatpush1.bf16.msra.mxu0 %v3551_v42  ;;  %1499 = vmatpush1.bf16.msra.mxu1 %v3552_v43  ;;  %v3636_v42 = vld [vmem:[#allocation5 + $0x30c] ss:$16 sps:$4 sm:$0xff]   ;;  %v3631_v43 = vld [vmem:[#allocation5 + $0x300] ss:$16 sps:$4 sm:$0xff]  }
  0x76   :  { %1328 = vmatprep.subr.bf16.mxu0 %v3553_v44  ;;  %1500 = vmatprep.subr.bf16.mxu1 %v3555_v45  ;;  %v3634_v44 = vld [vmem:[#allocation5 + $0x308] ss:$16 sps:$4 sm:$0xff]   ;;  %v3639_v45 = vld [vmem:[#allocation5 + $0x324] ss:$16 sps:$4 sm:$0xff]  }
  0x79   :  { %1329 = vmatpush1.bf16.msra.mxu0 %v3557_v48  ;;  %1501 = vmatpush1.bf16.msra.mxu1 %v3558_v49  ;;  %v3640_v48 = vld [vmem:[#allocation5 + $0x328] ss:$16 sps:$4 sm:$0xff]   ;;  %v3645_v49 = vld [vmem:[#allocation5 + $0x344] ss:$16 sps:$4 sm:$0xff]  }
  0x7a   :  { %1330 = vmatprep.subr.bf16.mxu0 %v3559_v51  ;;  %1502 = vmatprep.subr.bf16.mxu1 %v3561_v52  ;;  %v3643_v51 = vld [vmem:[#allocation5 + $0x340] ss:$16 sps:$4 sm:$0xff]   ;;  %v3646_v52 = vld [vmem:[#allocation5 + $0x348] ss:$16 sps:$4 sm:$0xff]  }
  0x7d   :  { %1331 = vmatpush1.bf16.msra.mxu0 %v3563_v53  ;;  %1503 = vmatpush1.bf16.msra.mxu1 %v3564_v54  ;;  %v3651_v53 = vld [vmem:[#allocation5 + $0x364] ss:$16 sps:$4 sm:$0xff]   ;;  %v3654_v54 = vld [vmem:[#allocation5 + $0x36c] ss:$16 sps:$4 sm:$0xff]  }
  0x7e   :  { %1332 = vmatprep.subr.bf16.mxu0 %v3565_v55  ;;  %1504 = vmatprep.subr.bf16.mxu1 %v3567_v56  ;;  %v3649_v55 = vld [vmem:[#allocation5 + $0x360] ss:$16 sps:$4 sm:$0xff]   ;;  %v3652_v56 = vld [vmem:[#allocation5 + $0x368] ss:$16 sps:$4 sm:$0xff]  }
  0x81   :  { %1333 = vmatpush1.bf16.msra.mxu0 %v3569_v57  ;;  %1505 = vmatpush1.bf16.msra.mxu1 %v3570_v58  ;;  %v3657_v57 = vld [vmem:[#allocation5 + $0x384] ss:$16 sps:$4 sm:$0xff]   ;;  %v3660_v58 = vld [vmem:[#allocation5 + $0x38c] ss:$16 sps:$4 sm:$0xff]  }
  0x82   :  { %1334 = vmatprep.subr.bf16.mxu0 %v3571_v59  ;;  %1506 = vmatprep.subr.bf16.mxu1 %v3573_v60  ;;  %v3655_v59 = vld [vmem:[#allocation5 + $0x380] ss:$16 sps:$4 sm:$0xff]   ;;  %v3658_v60 = vld [vmem:[#allocation5 + $0x388] ss:$16 sps:$4 sm:$0xff]  }
  0x85   :  { %1335 = vmatpush1.bf16.msra.mxu0 %v3575_v61  ;;  %1507 = vmatpush1.bf16.msra.mxu1 %v3576_v62  ;;  %v3663_v61 = vld [vmem:[#allocation5 + $0x3a4] ss:$16 sps:$4 sm:$0xff]   ;;  %v3666_v62 = vld [vmem:[#allocation5 + $0x3ac] ss:$16 sps:$4 sm:$0xff]  }
  0x86   :  { %1336 = vmatprep.subr.bf16.mxu0 %v3577_v63  ;;  %1508 = vmatprep.subr.bf16.mxu1 %v3579_v0  ;;  %v3661_v63 = vld [vmem:[#allocation5 + $0x3a0] ss:$16 sps:$4 sm:$0xff]   ;;  %v3664_v0 = vld [vmem:[#allocation5 + $0x3a8] ss:$16 sps:$4 sm:$0xff]  }
  0x89   :  { %1337 = vmatpush1.bf16.msra.mxu0 %v3581_v1  ;;  %1509 = vmatpush1.bf16.msra.mxu1 %v3582_v2  ;;  %v3669_v1 = vld [vmem:[#allocation5 + $0x3c4] ss:$16 sps:$4 sm:$0xff]   ;;  %v3672_v2 = vld [vmem:[#allocation5 + $0x3cc] ss:$16 sps:$4 sm:$0xff]  }
  0x8a   :  { %1349 = vmatprep.subr.bf16.mxu0 %v3585_v3  ;;  %1521 = vmatprep.subr.bf16.mxu1 %v3588_v6  ;;  %v3667_v3 = vld [vmem:[#allocation5 + $0x3c0] ss:$16 sps:$4 sm:$0xff]   ;;  %v3678_v6 = vld [vmem:[#allocation5 + $0x3ec] ss:$16 sps:$4 sm:$0xff]  }
  0x8c   :  { %1339 = vmatmul.mubr.bf16.vlgmr.msra.gmra.mrb[0].mxu0 %v97_v9  ;;  %1511 = vmatmul.mubr.bf16.vlgmr.msra.gmra.mrb[0].mxu1 %v97_v9  ;;  %v3681_v9 = vld [vmem:[#allocation5 + $0x404] ss:$16 sps:$4 sm:$0xff]  }
  0x8d   :  { %1350 = vmatpush1.bf16.msra.mxu0 %v3583_v7  ;;  %1522 = vmatpush1.bf16.msra.mxu1 %v3586_v8  ;;  %v3673_v7 = vld [vmem:[#allocation5 + $0x3e0] ss:$16 sps:$4 sm:$0xff]   ;;  %v3676_v8 = vld [vmem:[#allocation5 + $0x3e8] ss:$16 sps:$4 sm:$0xff]  }
  0x8e   :  { %1351 = vmatprep.subr.bf16.mxu0 %v3591_v10  ;;  %1523 = vmatprep.subr.bf16.mxu1 %v3594_v11  ;;  %v85_v10 = vld [vmem:[#allocation2 + $0x10] sm:$0xff]  ;;  %v92_v11 = vld [vmem:[#allocation2 + $0x48] sm:$0xff] }
  0x8f   :  { %1381 = vmatprep.mubr.bf16.mxu0 %v100_v36  ;;  %1553 = vmatprep.mubr.bf16.mxu1 %v100_v36  ;;  %v3714_v36 = vld [vmem:[#allocation5 + $0x4ac] ss:$16 sps:$4 sm:$0xff]  }
  0x91   :  { %1352 = vmatpush1.bf16.msra.mxu0 %v3589_v12  ;;  %1524 = vmatpush1.bf16.msra.mxu1 %v3592_v13  ;;  %v3684_v12 = vld [vmem:[#allocation5 + $0x40c] ss:$16 sps:$4 sm:$0xff]   ;;  %v3679_v13 = vld [vmem:[#allocation5 + $0x400] ss:$16 sps:$4 sm:$0xff]  }
  0x92   :  { %1353 = vmatprep.subr.bf16.mxu0 %v3597_v14  ;;  %1525 = vmatprep.subr.bf16.mxu1 %v3600_v15  ;;  %v3682_v14 = vld [vmem:[#allocation5 + $0x408] ss:$16 sps:$4 sm:$0xff]   ;;  %v99_v15 = vpack.c.bf16 %v92_v11, %v85_v10  ;;  %v3771_v11 = vld [vmem:[#allocation5 + $0x5e4] ss:$16 sps:$4 sm:$0xff]  }
  0x93   :  { %v3766_v10 = vld [vmem:[#allocation5 + $0x5c8] ss:$16 sps:$4 sm:$0xff]  }
  0x95   :  { %1354 = vmatpush1.bf16.msra.mxu0 %v3595_v16  ;;  %1526 = vmatpush1.bf16.msra.mxu1 %v3598_v17  ;;  %v3687_v16 = vld [vmem:[#allocation5 + $0x424] ss:$16 sps:$4 sm:$0xff]   ;;  %v3690_v17 = vld [vmem:[#allocation5 + $0x42c] ss:$16 sps:$4 sm:$0xff]  }
  0x96   :  { %1355 = vmatprep.subr.bf16.mxu0 %v3603_v18  ;;  %1527 = vmatprep.subr.bf16.mxu1 %v3606_v19  ;;  %v88_v18 = vld [vmem:[#allocation2 + $0x28] sm:$0xff]  ;;  %v3685_v19 = vld [vmem:[#allocation5 + $0x420] ss:$16 sps:$4 sm:$0xff]  }
  0x99   :  { %1356 = vmatpush1.bf16.msra.mxu0 %v3601_v20  ;;  %1528 = vmatpush1.bf16.msra.mxu1 %v3604_v21  ;;  %v3688_v20 = vld [vmem:[#allocation5 + $0x428] ss:$16 sps:$4 sm:$0xff]   ;;  %v95_v21 = vld [vmem:[#allocation2 + $0x60] sm:$0xff] }
  0x9a   :  { %1357 = vmatprep.subr.bf16.mxu0 %v3609_v22  ;;  %1529 = vmatprep.subr.bf16.mxu1 %v3612_v23  ;;  %v3693_v22 = vld [vmem:[#allocation5 + $0x444] ss:$16 sps:$4 sm:$0xff]   ;;  %v102_v23 = vpack.c.bf16 %v95_v21, %v88_v18  ;;  %v3780_v18 = vld [vmem:[#allocation5 + $0x60c] ss:$16 sps:$4 sm:$0xff]  }
  0x9d   :  { %1358 = vmatpush1.bf16.msra.mxu0 %v3607_v24  ;;  %1530 = vmatpush1.bf16.msra.mxu1 %v3610_v25  ;;  %v3696_v24 = vld [vmem:[#allocation5 + $0x44c] ss:$16 sps:$4 sm:$0xff]   ;;  %v3691_v25 = vld [vmem:[#allocation5 + $0x440] ss:$16 sps:$4 sm:$0xff]  }
  0x9e   :  { %1359 = vmatprep.subr.bf16.mxu0 %v3615_v26  ;;  %1531 = vmatprep.subr.bf16.mxu1 %v3618_v27  ;;  %v3694_v26 = vld [vmem:[#allocation5 + $0x448] ss:$16 sps:$4 sm:$0xff]   ;;  %v3699_v27 = vld [vmem:[#allocation5 + $0x464] ss:$16 sps:$4 sm:$0xff]  }
  0xa1   :  { %1360 = vmatpush1.bf16.msra.mxu0 %v3613_v28  ;;  %1532 = vmatpush1.bf16.msra.mxu1 %v3616_v29  ;;  %v3702_v28 = vld [vmem:[#allocation5 + $0x46c] ss:$16 sps:$4 sm:$0xff]   ;;  %v3697_v29 = vld [vmem:[#allocation5 + $0x460] ss:$16 sps:$4 sm:$0xff]  }
  0xa2   :  { %1361 = vmatprep.subr.bf16.mxu0 %v3621_v30  ;;  %1533 = vmatprep.subr.bf16.mxu1 %v3624_v31  ;;  %v3700_v30 = vld [vmem:[#allocation5 + $0x468] ss:$16 sps:$4 sm:$0xff]   ;;  %v3705_v31 = vld [vmem:[#allocation5 + $0x484] ss:$16 sps:$4 sm:$0xff]  }
  0xa5   :  { %1362 = vmatpush1.bf16.msra.mxu0 %v3619_v34  ;;  %1534 = vmatpush1.bf16.msra.mxu1 %v3622_v35  ;;  %v3706_v34 = vld [vmem:[#allocation5 + $0x488] ss:$16 sps:$4 sm:$0xff]   ;;  %v3711_v35 = vld [vmem:[#allocation5 + $0x4a4] ss:$16 sps:$4 sm:$0xff]  }
  0xa6   :  { %1363 = vmatprep.subr.bf16.mxu0 %v3627_v37  ;;  %1535 = vmatprep.subr.bf16.mxu1 %v3630_v38  ;;  %v3709_v37 = vld [vmem:[#allocation5 + $0x4a0] ss:$16 sps:$4 sm:$0xff]   ;;  %v3712_v38 = vld [vmem:[#allocation5 + $0x4a8] ss:$16 sps:$4 sm:$0xff]  }
  0xa9   :  { %1364 = vmatpush1.bf16.msra.mxu0 %v3625_v39  ;;  %1536 = vmatpush1.bf16.msra.mxu1 %v3628_v40  ;;  %v3717_v39 = vld [vmem:[#allocation5 + $0x4c4] ss:$16 sps:$4 sm:$0xff]   ;;  %v3720_v40 = vld [vmem:[#allocation5 + $0x4cc] ss:$16 sps:$4 sm:$0xff]  }
  0xaa   :  { %1365 = vmatprep.subr.bf16.mxu0 %v3633_v41  ;;  %1537 = vmatprep.subr.bf16.mxu1 %v3636_v42  ;;  %v3715_v41 = vld [vmem:[#allocation5 + $0x4c0] ss:$16 sps:$4 sm:$0xff]   ;;  %v3718_v42 = vld [vmem:[#allocation5 + $0x4c8] ss:$16 sps:$4 sm:$0xff]  }
  0xad   :  { %1366 = vmatpush1.bf16.msra.mxu0 %v3631_v43  ;;  %1538 = vmatpush1.bf16.msra.mxu1 %v3634_v44  ;;  %v3723_v43 = vld [vmem:[#allocation5 + $0x4e4] ss:$16 sps:$4 sm:$0xff]   ;;  %v3726_v44 = vld [vmem:[#allocation5 + $0x4ec] ss:$16 sps:$4 sm:$0xff]  }
  0xae   :  { %1367 = vmatprep.subr.bf16.mxu0 %v3639_v45  ;;  %1539 = vmatprep.subr.bf16.mxu1 %v3642_v46  ;;  %v3721_v45 = vld [vmem:[#allocation5 + $0x4e0] ss:$16 sps:$4 sm:$0xff]   ;;  %v3724_v46 = vld [vmem:[#allocation5 + $0x4e8] ss:$16 sps:$4 sm:$0xff]  }
  0xb1   :  { %1368 = vmatpush1.bf16.msra.mxu0 %v3637_v47  ;;  %1540 = vmatpush1.bf16.msra.mxu1 %v3640_v48  ;;  %v3729_v47 = vld [vmem:[#allocation5 + $0x504] ss:$16 sps:$4 sm:$0xff]   ;;  %v3732_v48 = vld [vmem:[#allocation5 + $0x50c] ss:$16 sps:$4 sm:$0xff]  }
  0xb2   :  { %1369 = vmatprep.subr.bf16.mxu0 %v3645_v49  ;;  %1541 = vmatprep.subr.bf16.mxu1 %v3648_v50  ;;  %v3727_v49 = vld [vmem:[#allocation5 + $0x500] ss:$16 sps:$4 sm:$0xff]   ;;  %v3730_v50 = vld [vmem:[#allocation5 + $0x508] ss:$16 sps:$4 sm:$0xff]  }
  0xb5   :  { %1370 = vmatpush1.bf16.msra.mxu0 %v3643_v51  ;;  %1542 = vmatpush1.bf16.msra.mxu1 %v3646_v52  ;;  %v3735_v51 = vld [vmem:[#allocation5 + $0x524] ss:$16 sps:$4 sm:$0xff]   ;;  %v3738_v52 = vld [vmem:[#allocation5 + $0x52c] ss:$16 sps:$4 sm:$0xff]  }
  0xb6   :  { %1371 = vmatprep.subr.bf16.mxu0 %v3651_v53  ;;  %1543 = vmatprep.subr.bf16.mxu1 %v3654_v54  ;;  %v3733_v53 = vld [vmem:[#allocation5 + $0x520] ss:$16 sps:$4 sm:$0xff]   ;;  %v3736_v54 = vld [vmem:[#allocation5 + $0x528] ss:$16 sps:$4 sm:$0xff]  }
  0xb9   :  { %1372 = vmatpush1.bf16.msra.mxu0 %v3649_v55  ;;  %1544 = vmatpush1.bf16.msra.mxu1 %v3652_v56  ;;  %v3741_v55 = vld [vmem:[#allocation5 + $0x544] ss:$16 sps:$4 sm:$0xff]   ;;  %v3744_v56 = vld [vmem:[#allocation5 + $0x54c] ss:$16 sps:$4 sm:$0xff]  }
  0xba   :  { %1373 = vmatprep.subr.bf16.mxu0 %v3657_v57  ;;  %1545 = vmatprep.subr.bf16.mxu1 %v3660_v58  ;;  %v3739_v57 = vld [vmem:[#allocation5 + $0x540] ss:$16 sps:$4 sm:$0xff]   ;;  %v3742_v58 = vld [vmem:[#allocation5 + $0x548] ss:$16 sps:$4 sm:$0xff]  }
  0xbd   :  { %1374 = vmatpush1.bf16.msra.mxu0 %v3655_v59  ;;  %1546 = vmatpush1.bf16.msra.mxu1 %v3658_v60  ;;  %v3747_v59 = vld [vmem:[#allocation5 + $0x564] ss:$16 sps:$4 sm:$0xff]   ;;  %v3750_v60 = vld [vmem:[#allocation5 + $0x56c] ss:$16 sps:$4 sm:$0xff]  }
  0xbe   :  { %1375 = vmatprep.subr.bf16.mxu0 %v3663_v61  ;;  %1547 = vmatprep.subr.bf16.mxu1 %v3666_v62  ;;  %v3745_v61 = vld [vmem:[#allocation5 + $0x560] ss:$16 sps:$4 sm:$0xff]   ;;  %v3748_v62 = vld [vmem:[#allocation5 + $0x568] ss:$16 sps:$4 sm:$0xff]  }
  0xc1   :  { %1376 = vmatpush1.bf16.msra.mxu0 %v3661_v63  ;;  %1548 = vmatpush1.bf16.msra.mxu1 %v3664_v0  ;;  %v3753_v63 = vld [vmem:[#allocation5 + $0x584] ss:$16 sps:$4 sm:$0xff]   ;;  %v3756_v0 = vld [vmem:[#allocation5 + $0x58c] ss:$16 sps:$4 sm:$0xff]  }
  0xc2   :  { %1377 = vmatprep.subr.bf16.mxu0 %v3669_v1  ;;  %1549 = vmatprep.subr.bf16.mxu1 %v3672_v2  ;;  %v3751_v1 = vld [vmem:[#allocation5 + $0x580] ss:$16 sps:$4 sm:$0xff]   ;;  %v3754_v2 = vld [vmem:[#allocation5 + $0x588] ss:$16 sps:$4 sm:$0xff]  }
  0xc5   :  { %1378 = vmatpush1.bf16.msra.mxu0 %v3667_v3  ;;  %1550 = vmatpush1.bf16.msra.mxu1 %v3670_v4  ;;  %v3759_v3 = vld [vmem:[#allocation5 + $0x5a4] ss:$16 sps:$4 sm:$0xff]   ;;  %v3762_v4 = vld [vmem:[#allocation5 + $0x5ac] ss:$16 sps:$4 sm:$0xff]  }
  0xc6   :  { %1379 = vmatprep.subr.bf16.mxu0 %v3675_v5  ;;  %1551 = vmatprep.subr.bf16.mxu1 %v3678_v6  ;;  %v3757_v5 = vld [vmem:[#allocation5 + $0x5a0] ss:$16 sps:$4 sm:$0xff]   ;;  %v3760_v6 = vld [vmem:[#allocation5 + $0x5a8] ss:$16 sps:$4 sm:$0xff]  }
  0xc9   :  { %1380 = vmatpush1.bf16.msra.mxu0 %v3673_v7  ;;  %1552 = vmatpush1.bf16.msra.mxu1 %v3676_v8  ;;  %v3765_v7 = vld [vmem:[#allocation5 + $0x5c4] ss:$16 sps:$4 sm:$0xff]   ;;  %v3768_v8 = vld [vmem:[#allocation5 + $0x5cc] ss:$16 sps:$4 sm:$0xff]  }
  0xca   :  { %1392 = vmatprep.subr.bf16.mxu0 %v3681_v9  ;;  %1564 = vmatprep.subr.bf16.mxu1 %v3684_v12  ;;  %v3763_v9 = vld [vmem:[#allocation5 + $0x5c0] ss:$16 sps:$4 sm:$0xff]   ;;  %v3774_v12 = vld [vmem:[#allocation5 + $0x5ec] ss:$16 sps:$4 sm:$0xff]  }
  0xcc   :  { %1382 = vmatmul.mubr.bf16.vlgmr.msra.gmra.mrb[0].mxu0 %v99_v15  ;;  %1554 = vmatmul.mubr.bf16.vlgmr.msra.gmra.mrb[0].mxu1 %v99_v15  ;;  %v87_v15 = vld [vmem:[#allocation2 + $0x20] sm:$0xff] }
  0xcd   :  { %1393 = vmatpush1.bf16.msra.mxu0 %v3679_v13  ;;  %1565 = vmatpush1.bf16.msra.mxu1 %v3682_v14  ;;  %v3769_v13 = vld [vmem:[#allocation5 + $0x5e0] ss:$16 sps:$4 sm:$0xff]   ;;  %v3772_v14 = vld [vmem:[#allocation5 + $0x5e8] ss:$16 sps:$4 sm:$0xff]  }
  0xce   :  { %1394 = vmatprep.subr.bf16.mxu0 %v3687_v16  ;;  %1566 = vmatprep.subr.bf16.mxu1 %v3690_v17  ;;  %v94_v16 = vld [vmem:[#allocation2 + $0x58] sm:$0xff]  ;;  %v3777_v17 = vld [vmem:[#allocation5 + $0x604] ss:$16 sps:$4 sm:$0xff]  }
  0xcf   :  { %1424 = vmatprep.mubr.bf16.mxu0 %v102_v23  ;;  %1596 = vmatprep.mubr.bf16.mxu1 %v102_v23  ;;  %v101_v21 = vpack.c.bf16 %v94_v16, %v87_v15  ;;  %v3786_v23 = vld [vmem:[#allocation7 + $0xc] ss:$16 sps:$4 sm:$0xff]   ;;  %v3859_v16 = vld [vmem:[#allocation7 + $0x1a0] ss:$16 sps:$4 sm:$0xff]  }
  0xd0   :  { %v3864_v15 = vld [vmem:[#allocation7 + $0x1ac] ss:$16 sps:$4 sm:$0xff]  }
  0xd1   :  { %1395 = vmatpush1.bf16.msra.mxu0 %v3685_v19  ;;  %1567 = vmatpush1.bf16.msra.mxu1 %v3688_v20  ;;  %v3775_v19 = vld [vmem:[#allocation5 + $0x600] ss:$16 sps:$4 sm:$0xff]   ;;  %v3778_v20 = vld [vmem:[#allocation5 + $0x608] ss:$16 sps:$4 sm:$0xff]  }
  0xd2   :  { %1396 = vmatprep.subr.bf16.mxu0 %v3693_v22  ;;  %1568 = vmatprep.subr.bf16.mxu1 %v3696_v24  ;;  %v3783_v22 = vld [vmem:[#allocation7 + $0x4] ss:$16 sps:$4 sm:$0xff]   ;;  %v4141_v24 = vmov 0  }
  0xd5   :  { %1397 = vmatpush1.bf16.msra.mxu0 %v3691_v25  ;;  %1569 = vmatpush1.bf16.msra.mxu1 %v3694_v26  ;;  %v89_v25 = vld [vmem:[#allocation2 + $0x30] sm:$0xff]  ;;  %v96_v26 = vld [vmem:[#allocation2 + $0x68] sm:$0xff] }
  0xd6   :  { %1398 = vmatprep.subr.bf16.mxu0 %v3699_v27  ;;  %1570 = vmatprep.subr.bf16.mxu1 %v3702_v28  ;;  %v3781_v27 = vld [vmem:[#allocation7] ss:$16 sps:$4 sm:$0xff]   ;;  %v3784_v28 = vld [vmem:[#allocation7 + $0x8] ss:$16 sps:$4 sm:$0xff]  }
  0xd9   :  { %1399 = vmatpush1.bf16.msra.mxu0 %v3697_v29  ;;  %1571 = vmatpush1.bf16.msra.mxu1 %v3700_v30  ;;  %v103_v29 = vpack.c.bf16 %v96_v26, %v89_v25  ;;  %v3789_v30 = vld [vmem:[#allocation7 + $0x24] ss:$16 sps:$4 sm:$0xff]   ;;  %v3874_v25 = vld [vmem:[#allocation7 + $0x1e8] ss:$16 sps:$4 sm:$0xff]  }
  0xda   :  { %1400 = vmatprep.subr.bf16.mxu0 %v3705_v31  ;;  %1572 = vmatprep.subr.bf16.mxu1 %v3708_v32  ;;  %v3792_v31 = vld [vmem:[#allocation7 + $0x2c] ss:$16 sps:$4 sm:$0xff]   ;;  %v3787_v32 = vld [vmem:[#allocation7 + $0x20] ss:$16 sps:$4 sm:$0xff]   ;;  %v3879_v26 = vld [vmem:[#allocation7 + $0x204] ss:$16 sps:$4 sm:$0xff]  }
  0xdd   :  { %1401 = vmatpush1.bf16.msra.mxu0 %v3703_v33  ;;  %1573 = vmatpush1.bf16.msra.mxu1 %v3706_v34  ;;  %v3790_v33 = vld [vmem:[#allocation7 + $0x28] ss:$16 sps:$4 sm:$0xff]   ;;  %v3795_v34 = vld [vmem:[#allocation7 + $0x44] ss:$16 sps:$4 sm:$0xff]  }
  0xde   :  { %1402 = vmatprep.subr.bf16.mxu0 %v3711_v35  ;;  %1574 = vmatprep.subr.bf16.mxu1 %v3714_v36  ;;  %v3798_v35 = vld [vmem:[#allocation7 + $0x4c] ss:$16 sps:$4 sm:$0xff]   ;;  %v3793_v36 = vld [vmem:[#allocation7 + $0x40] ss:$16 sps:$4 sm:$0xff]  }
  0xe1   :  { %1403 = vmatpush1.bf16.msra.mxu0 %v3709_v37  ;;  %1575 = vmatpush1.bf16.msra.mxu1 %v3712_v38  ;;  %v3796_v37 = vld [vmem:[#allocation7 + $0x48] ss:$16 sps:$4 sm:$0xff]   ;;  %v3801_v38 = vld [vmem:[#allocation7 + $0x64] ss:$16 sps:$4 sm:$0xff]  }
  0xe2   :  { %1404 = vmatprep.subr.bf16.mxu0 %v3717_v39  ;;  %1576 = vmatprep.subr.bf16.mxu1 %v3720_v40  ;;  %v3804_v39 = vld [vmem:[#allocation7 + $0x6c] ss:$16 sps:$4 sm:$0xff]   ;;  %v3799_v40 = vld [vmem:[#allocation7 + $0x60] ss:$16 sps:$4 sm:$0xff]  }
  0xe5   :  { %1405 = vmatpush1.bf16.msra.mxu0 %v3715_v41  ;;  %1577 = vmatpush1.bf16.msra.mxu1 %v3718_v42  ;;  %v3802_v41 = vld [vmem:[#allocation7 + $0x68] ss:$16 sps:$4 sm:$0xff]   ;;  %v3807_v42 = vld [vmem:[#allocation7 + $0x84] ss:$16 sps:$4 sm:$0xff]  }
  0xe6   :  { %1406 = vmatprep.subr.bf16.mxu0 %v3723_v43  ;;  %1578 = vmatprep.subr.bf16.mxu1 %v3726_v44  ;;  %v3810_v43 = vld [vmem:[#allocation7 + $0x8c] ss:$16 sps:$4 sm:$0xff]   ;;  %v3805_v44 = vld [vmem:[#allocation7 + $0x80] ss:$16 sps:$4 sm:$0xff]  }
  0xe9   :  { %1407 = vmatpush1.bf16.msra.mxu0 %v3721_v45  ;;  %1579 = vmatpush1.bf16.msra.mxu1 %v3724_v46  ;;  %v3808_v45 = vld [vmem:[#allocation7 + $0x88] ss:$16 sps:$4 sm:$0xff]   ;;  %v3813_v46 = vld [vmem:[#allocation7 + $0xa4] ss:$16 sps:$4 sm:$0xff]  }
  0xea   :  { %1408 = vmatprep.subr.bf16.mxu0 %v3729_v47  ;;  %1580 = vmatprep.subr.bf16.mxu1 %v3732_v48  ;;  %v3816_v47 = vld [vmem:[#allocation7 + $0xac] ss:$16 sps:$4 sm:$0xff]   ;;  %v3811_v48 = vld [vmem:[#allocation7 + $0xa0] ss:$16 sps:$4 sm:$0xff]  }
  0xed   :  { %1409 = vmatpush1.bf16.msra.mxu0 %v3727_v49  ;;  %1581 = vmatpush1.bf16.msra.mxu1 %v3730_v50  ;;  %v3814_v49 = vld [vmem:[#allocation7 + $0xa8] ss:$16 sps:$4 sm:$0xff]   ;;  %v3819_v50 = vld [vmem:[#allocation7 + $0xc4] ss:$16 sps:$4 sm:$0xff]  }
  0xee   :  { %1410 = vmatprep.subr.bf16.mxu0 %v3735_v51  ;;  %1582 = vmatprep.subr.bf16.mxu1 %v3738_v52  ;;  %v3822_v51 = vld [vmem:[#allocation7 + $0xcc] ss:$16 sps:$4 sm:$0xff]   ;;  %v3817_v52 = vld [vmem:[#allocation7 + $0xc0] ss:$16 sps:$4 sm:$0xff]  }
  0xf1   :  { %1411 = vmatpush1.bf16.msra.mxu0 %v3733_v53  ;;  %1583 = vmatpush1.bf16.msra.mxu1 %v3736_v54  ;;  %v3820_v53 = vld [vmem:[#allocation7 + $0xc8] ss:$16 sps:$4 sm:$0xff]   ;;  %v3825_v54 = vld [vmem:[#allocation7 + $0xe4] ss:$16 sps:$4 sm:$0xff]  }
  0xf2   :  { %1412 = vmatprep.subr.bf16.mxu0 %v3741_v55  ;;  %1584 = vmatprep.subr.bf16.mxu1 %v3744_v56  ;;  %v3828_v55 = vld [vmem:[#allocation7 + $0xec] ss:$16 sps:$4 sm:$0xff]   ;;  %v3823_v56 = vld [vmem:[#allocation7 + $0xe0] ss:$16 sps:$4 sm:$0xff]  }
  0xf5   :  { %1413 = vmatpush1.bf16.msra.mxu0 %v3739_v57  ;;  %1585 = vmatpush1.bf16.msra.mxu1 %v3742_v58  ;;  %v3826_v57 = vld [vmem:[#allocation7 + $0xe8] ss:$16 sps:$4 sm:$0xff]   ;;  %v3831_v58 = vld [vmem:[#allocation7 + $0x104] ss:$16 sps:$4 sm:$0xff]  }
  0xf6   :  { %1414 = vmatprep.subr.bf16.mxu0 %v3747_v59  ;;  %1586 = vmatprep.subr.bf16.mxu1 %v3750_v60  ;;  %v3834_v59 = vld [vmem:[#allocation7 + $0x10c] ss:$16 sps:$4 sm:$0xff]   ;;  %v3829_v60 = vld [vmem:[#allocation7 + $0x100] ss:$16 sps:$4 sm:$0xff]  }
  0xf9   :  { %1415 = vmatpush1.bf16.msra.mxu0 %v3745_v61  ;;  %1587 = vmatpush1.bf16.msra.mxu1 %v3748_v62  ;;  %v3832_v61 = vld [vmem:[#allocation7 + $0x108] ss:$16 sps:$4 sm:$0xff]   ;;  %v3837_v62 = vld [vmem:[#allocation7 + $0x124] ss:$16 sps:$4 sm:$0xff]  }
  0xfa   :  { %1416 = vmatprep.subr.bf16.mxu0 %v3753_v63  ;;  %1588 = vmatprep.subr.bf16.mxu1 %v3756_v0  ;;  %v3840_v63 = vld [vmem:[#allocation7 + $0x12c] ss:$16 sps:$4 sm:$0xff]   ;;  %v3835_v0 = vld [vmem:[#allocation7 + $0x120] ss:$16 sps:$4 sm:$0xff]  }
  0xfd   :  { %1417 = vmatpush1.bf16.msra.mxu0 %v3751_v1  ;;  %1589 = vmatpush1.bf16.msra.mxu1 %v3754_v2  ;;  %v3838_v1 = vld [vmem:[#allocation7 + $0x128] ss:$16 sps:$4 sm:$0xff]   ;;  %v3843_v2 = vld [vmem:[#allocation7 + $0x144] ss:$16 sps:$4 sm:$0xff]  }
  0xfe   :  { %1418 = vmatprep.subr.bf16.mxu0 %v3759_v3  ;;  %1590 = vmatprep.subr.bf16.mxu1 %v3762_v4  ;;  %v3846_v3 = vld [vmem:[#allocation7 + $0x14c] ss:$16 sps:$4 sm:$0xff]   ;;  %v3841_v4 = vld [vmem:[#allocation7 + $0x140] ss:$16 sps:$4 sm:$0xff]  }
 0x101   :  { %1419 = vmatpush1.bf16.msra.mxu0 %v3757_v5  ;;  %1591 = vmatpush1.bf16.msra.mxu1 %v3760_v6  ;;  %v3844_v5 = vld [vmem:[#allocation7 + $0x148] ss:$16 sps:$4 sm:$0xff]   ;;  %v3849_v6 = vld [vmem:[#allocation7 + $0x164] ss:$16 sps:$4 sm:$0xff]  }
 0x102   :  { %1420 = vmatprep.subr.bf16.mxu0 %v3765_v7  ;;  %1592 = vmatprep.subr.bf16.mxu1 %v3768_v8  ;;  %v3852_v7 = vld [vmem:[#allocation7 + $0x16c] ss:$16 sps:$4 sm:$0xff]   ;;  %v3847_v8 = vld [vmem:[#allocation7 + $0x160] ss:$16 sps:$4 sm:$0xff]  }
 0x105   :  { %1421 = vmatpush1.bf16.msra.mxu0 %v3763_v9  ;;  %1593 = vmatpush1.bf16.msra.mxu1 %v3766_v10  ;;  %v3850_v9 = vld [vmem:[#allocation7 + $0x168] ss:$16 sps:$4 sm:$0xff]   ;;  %v3855_v10 = vld [vmem:[#allocation7 + $0x184] ss:$16 sps:$4 sm:$0xff]  }
 0x106   :  { %1422 = vmatprep.subr.bf16.mxu0 %v3771_v11  ;;  %1594 = vmatprep.subr.bf16.mxu1 %v3774_v12  ;;  %v3858_v11 = vld [vmem:[#allocation7 + $0x18c] ss:$16 sps:$4 sm:$0xff]   ;;  %v3853_v12 = vld [vmem:[#allocation7 + $0x180] ss:$16 sps:$4 sm:$0xff]  }
 0x109   :  { %1423 = vmatpush1.bf16.msra.mxu0 %v3769_v13  ;;  %1595 = vmatpush1.bf16.msra.mxu1 %v3772_v14  ;;  %v3856_v13 = vld [vmem:[#allocation7 + $0x188] ss:$16 sps:$4 sm:$0xff]   ;;  %v3861_v14 = vld [vmem:[#allocation7 + $0x1a4] ss:$16 sps:$4 sm:$0xff]  }
 0x10a   :  { %1435 = vmatprep.subr.bf16.mxu0 %v3777_v17  ;;  %1607 = vmatprep.subr.bf16.mxu1 %v3780_v18  ;;  %v3862_v17 = vld [vmem:[#allocation7 + $0x1a8] ss:$16 sps:$4 sm:$0xff]   ;;  %v3867_v18 = vld [vmem:[#allocation7 + $0x1c4] ss:$16 sps:$4 sm:$0xff]  }
 0x10c   :  { %1425 = vmatmul.mubr.bf16.vlgmr.msra.gmra.mrb[0].mxu0 %v101_v21  ;;  %1597 = vmatmul.mubr.bf16.vlgmr.msra.gmra.mrb[0].mxu1 %v101_v21  ;;  %v3868_v21 = vld [vmem:[#allocation7 + $0x1c8] ss:$16 sps:$4 sm:$0xff]  }
 0x10d   :  { %1436 = vmatpush1.bf16.msra.mxu0 %v3775_v19  ;;  %1608 = vmatpush1.bf16.msra.mxu1 %v3778_v20  ;;  %v3870_v19 = vld [vmem:[#allocation7 + $0x1cc] ss:$16 sps:$4 sm:$0xff]   ;;  %v3865_v20 = vld [vmem:[#allocation7 + $0x1c0] ss:$16 sps:$4 sm:$0xff]  }
 0x10e   :  { %1467 = vmatprep.mubr.bf16.mxu0 %v4141_v24  ;;  %1639 = vmatprep.mubr.bf16.mxu1 %v4141_v24  ;;  %v3871_v24 = vld [vmem:[#allocation7 + $0x1e0] ss:$16 sps:$4 sm:$0xff]  }
 0x10f   :  { %2452 = vmatprep.subr.bf16.mxu0 %v3783_v22  ;;  %2538 = vmatprep.subr.bf16.mxu1 %v3786_v23  ;;  %v3873_v22 = vld [vmem:[#allocation7 + $0x1e4] ss:$16 sps:$4 sm:$0xff]   ;;  %v3876_v23 = vld [vmem:[#allocation7 + $0x1ec] ss:$16 sps:$4 sm:$0xff]  }
 0x118   :  { %3218 = vmatmul.mubr.msk.bf16.vlgmr.msra.gmra.mrb[0].mxu0 %vm1302_vm0, %v103_v29  ;;  %3219 = vmatmul.mubr.msk.bf16.vlgmr.msra.gmra.mrb[0].mxu1 %vm1302_vm0, %v103_v29 }
 0x119   :  { %2453 = vmatpush1.bf16.msra.mxu0 %v3781_v27  ;;  %2539 = vmatpush1.bf16.msra.mxu1 %v3784_v28  ;;  %v3882_v27 = vld [vmem:[#allocation7 + $0x20c] ss:$16 sps:$4 sm:$0xff]   ;;  %v302_v28 = vlaneseq }
 0x11a   :  { %2454 = vmatprep.subr.bf16.mxu0 %v3789_v30  ;;  %2540 = vmatprep.subr.bf16.mxu1 %v3792_v31 }
 0x11b   :  { %v4248_v29 = vshrl.u32 %v302_v28, 7  ;;  %v3916_v28 = vld [vmem:[#allocation7 + $0x2c8] ss:$16 sps:$4 sm:$0xff]  }
 0x11d   :  { %2455 = vmatpush1.bf16.msra.mxu0 %v3787_v32  ;;  %2541 = vmatpush1.bf16.msra.mxu1 %v3790_v33  ;;  %v304_v30 = vsub.s32 0, %v4248_v29  ;;  %v312_v31 = vsub.s32 2, %v4248_v29  ;;  %v300_v32 = vld [vmem:[%s4297_s2] sm:$0xf]  ;;  %v308_v33 = vsub.s32 1, %v4248_v29 }
 0x11e   :  { %2456 = vmatprep.subr.bf16.mxu0 %v3795_v34  ;;  %2542 = vmatprep.subr.bf16.mxu1 %v3798_v35  ;;  %v316_v34 = vsub.s32 3, %v4248_v29 }
 0x11f   :  { %v305_v35 = vrot.slane %v300_v32, %v304_v30 }
 0x121   :  { %2457 = vmatpush1.bf16.msra.mxu0 %v3793_v36  ;;  %2543 = vmatpush1.bf16.msra.mxu1 %v3796_v37  ;;  %v313_v36 = vrot.slane %v300_v32, %v312_v31  ;;  %v309_v37 = vrot.slane %v300_v32, %v308_v33 }
 0x122   :  { %2458 = vmatprep.subr.bf16.mxu0 %v3801_v38  ;;  %2544 = vmatprep.subr.bf16.mxu1 %v3804_v39  ;;  %v317_v38 = vrot.slane %v300_v32, %v316_v34  ;;  %v3921_v32 = vld [vmem:[#allocation7 + $0x2e4] ss:$16 sps:$4 sm:$0xff]  }
 0x125   :  { %2459 = vmatpush1.bf16.msra.mxu0 %v3799_v40  ;;  %2545 = vmatpush1.bf16.msra.mxu1 %v3802_v41 }
 0x126   :  { %2460 = vmatprep.subr.bf16.mxu0 %v3807_v42  ;;  %2546 = vmatprep.subr.bf16.mxu1 %v3810_v43 }
 0x129   :  { %2461 = vmatpush1.bf16.msra.mxu0 %v3805_v44  ;;  %2547 = vmatpush1.bf16.msra.mxu1 %v3808_v45 }
 0x12a   :  { %2462 = vmatprep.subr.bf16.mxu0 %v3813_v46  ;;  %2548 = vmatprep.subr.bf16.mxu1 %v3816_v47 }
 0x12d   :  { %2463 = vmatpush1.bf16.msra.mxu0 %v3811_v48  ;;  %2549 = vmatpush1.bf16.msra.mxu1 %v3814_v49 }
 0x12e   :  { %2464 = vmatprep.subr.bf16.mxu0 %v3819_v50  ;;  %2550 = vmatprep.subr.bf16.mxu1 %v3822_v51 }
 0x131   :  { %2465 = vmatpush1.bf16.msra.mxu0 %v3817_v52  ;;  %2551 = vmatpush1.bf16.msra.mxu1 %v3820_v53 }
 0x132   :  { %2466 = vmatprep.subr.bf16.mxu0 %v3825_v54  ;;  %2552 = vmatprep.subr.bf16.mxu1 %v3828_v55 }
 0x135   :  { %2467 = vmatpush1.bf16.msra.mxu0 %v3823_v56  ;;  %2553 = vmatpush1.bf16.msra.mxu1 %v3826_v57 }
 0x136   :  { %2468 = vmatprep.subr.bf16.mxu0 %v3831_v58  ;;  %2554 = vmatprep.subr.bf16.mxu1 %v3834_v59 }
 0x139   :  { %2469 = vmatpush1.bf16.msra.mxu0 %v3829_v60  ;;  %2555 = vmatpush1.bf16.msra.mxu1 %v3832_v61 }
 0x13a   :  { %2470 = vmatprep.subr.bf16.mxu0 %v3837_v62  ;;  %2556 = vmatprep.subr.bf16.mxu1 %v3840_v63 }
 0x13d   :  { %2471 = vmatpush1.bf16.msra.mxu0 %v3835_v0  ;;  %2557 = vmatpush1.bf16.msra.mxu1 %v3838_v1 }
 0x13e   :  { %2472 = vmatprep.subr.bf16.mxu0 %v3843_v2  ;;  %2558 = vmatprep.subr.bf16.mxu1 %v3846_v3  ;;  %v3877_v3 = vld [vmem:[#allocation7 + $0x200] ss:$16 sps:$4 sm:$0xff]  }
 0x141   :  { %2473 = vmatpush1.bf16.msra.mxu0 %v3841_v4  ;;  %2559 = vmatpush1.bf16.msra.mxu1 %v3844_v5  ;;  %v3880_v4 = vld [vmem:[#allocation7 + $0x208] ss:$16 sps:$4 sm:$0xff]   ;;  %v3885_v5 = vld [vmem:[#allocation7 + $0x224] ss:$16 sps:$4 sm:$0xff]  }
 0x142   :  { %2474 = vmatprep.subr.bf16.mxu0 %v3849_v6  ;;  %2560 = vmatprep.subr.bf16.mxu1 %v3852_v7  ;;  %v3888_v6 = vld [vmem:[#allocation7 + $0x22c] ss:$16 sps:$4 sm:$0xff]   ;;  %v3883_v7 = vld [vmem:[#allocation7 + $0x220] ss:$16 sps:$4 sm:$0xff]  }
 0x145   :  { %2475 = vmatpush1.bf16.msra.mxu0 %v3847_v8  ;;  %2561 = vmatpush1.bf16.msra.mxu1 %v3850_v9  ;;  %v3886_v8 = vld [vmem:[#allocation7 + $0x228] ss:$16 sps:$4 sm:$0xff]   ;;  %v3891_v9 = vld [vmem:[#allocation7 + $0x244] ss:$16 sps:$4 sm:$0xff]  }
 0x146   :  { %2476 = vmatprep.subr.bf16.mxu0 %v3855_v10  ;;  %2562 = vmatprep.subr.bf16.mxu1 %v3858_v11  ;;  %v3894_v10 = vld [vmem:[#allocation7 + $0x24c] ss:$16 sps:$4 sm:$0xff]   ;;  %v3889_v11 = vld [vmem:[#allocation7 + $0x240] ss:$16 sps:$4 sm:$0xff]  }
 0x149   :  { %2477 = vmatpush1.bf16.msra.mxu0 %v3853_v12  ;;  %2563 = vmatpush1.bf16.msra.mxu1 %v3856_v13  ;;  %v3892_v12 = vld [vmem:[#allocation7 + $0x248] ss:$16 sps:$4 sm:$0xff]   ;;  %v3897_v13 = vld [vmem:[#allocation7 + $0x264] ss:$16 sps:$4 sm:$0xff]  }
 0x14a   :  { %2478 = vmatprep.subr.bf16.mxu0 %v3861_v14  ;;  %2564 = vmatprep.subr.bf16.mxu1 %v3864_v15  ;;  %v3900_v14 = vld [vmem:[#allocation7 + $0x26c] ss:$16 sps:$4 sm:$0xff]   ;;  %v3895_v15 = vld [vmem:[#allocation7 + $0x260] ss:$16 sps:$4 sm:$0xff]  }
 0x14d   :  { %2479 = vmatpush1.bf16.msra.mxu0 %v3859_v16  ;;  %2565 = vmatpush1.bf16.msra.mxu1 %v3862_v17  ;;  %v3898_v16 = vld [vmem:[#allocation7 + $0x268] ss:$16 sps:$4 sm:$0xff]   ;;  %v3903_v17 = vld [vmem:[#allocation7 + $0x284] ss:$16 sps:$4 sm:$0xff]  }
 0x14e   :  { %2480 = vmatprep.subr.bf16.mxu0 %v3867_v18  ;;  %2566 = vmatprep.subr.bf16.mxu1 %v3870_v19  ;;  %v3906_v18 = vld [vmem:[#allocation7 + $0x28c] ss:$16 sps:$4 sm:$0xff]   ;;  %v3901_v19 = vld [vmem:[#allocation7 + $0x280] ss:$16 sps:$4 sm:$0xff]  }
 0x151   :  { %2481 = vmatpush1.bf16.msra.mxu0 %v3865_v20  ;;  %2567 = vmatpush1.bf16.msra.mxu1 %v3868_v21  ;;  %v3904_v20 = vld [vmem:[#allocation7 + $0x288] ss:$16 sps:$4 sm:$0xff]   ;;  %v3909_v21 = vld [vmem:[#allocation7 + $0x2a4] ss:$16 sps:$4 sm:$0xff]  }
 0x152   :  { %2482 = vmatprep.subr.bf16.mxu0 %v3873_v22  ;;  %2568 = vmatprep.subr.bf16.mxu1 %v3876_v23  ;;  %v3912_v22 = vld [vmem:[#allocation7 + $0x2ac] ss:$16 sps:$4 sm:$0xff]   ;;  %v3907_v23 = vld [vmem:[#allocation7 + $0x2a0] ss:$16 sps:$4 sm:$0xff]  }
 0x155   :  { %2483 = vmatpush1.bf16.msra.mxu0 %v3871_v24  ;;  %2569 = vmatpush1.bf16.msra.mxu1 %v3874_v25  ;;  %v3910_v24 = vld [vmem:[#allocation7 + $0x2a8] ss:$16 sps:$4 sm:$0xff]   ;;  %v3915_v25 = vld [vmem:[#allocation7 + $0x2c4] ss:$16 sps:$4 sm:$0xff]  }
 0x156   :  { %2495 = vmatprep.subr.bf16.mxu0 %v3879_v26  ;;  %2581 = vmatprep.subr.bf16.mxu1 %v3882_v27  ;;  %v3918_v26 = vld [vmem:[#allocation7 + $0x2cc] ss:$16 sps:$4 sm:$0xff]   ;;  %v3913_v27 = vld [vmem:[#allocation7 + $0x2c0] ss:$16 sps:$4 sm:$0xff]  }
 0x1eb   :  { %v1469_v39 = vpop.f32.mrb[0].mxu0  ;;  %v1641_v40 = vpop.f32.mrb[0].mxu1 }
 0x1ec   :  { %v3425_v41 = vadd.f32 %v1469_v39, %v305_v35  ;;  %v3429_v42 = vadd.f32 %v1641_v40, %v313_v36  ;;  %v1471_v43 = vpop.f32.mrb[1].mxu0  ;;  %v1643_v44 = vpop.f32.mrb[1].mxu1  ;;  %v3930_v39 = vld [vmem:[#allocation7 + $0x30c] ss:$16 sps:$4 sm:$0xff]   ;;  %v3925_v40 = vld [vmem:[#allocation7 + $0x300] ss:$16 sps:$4 sm:$0xff]  }
 0x1ed   :  { %v3426_v45 = vadd.f32 %v1471_v43, %v309_v37  ;;  %v3430_v46 = vadd.f32 %v1643_v44, %v317_v38  ;;  %v1473_v47 = vpop.f32.mrb[2].mxu0  ;;  %v1645_v48 = vpop.f32.mrb[2].mxu1  ;;  %v3936_v43 = vld [vmem:[#allocation7 + $0x32c] ss:$16 sps:$4 sm:$0xff]   ;;  %v3931_v44 = vld [vmem:[#allocation7 + $0x320] ss:$16 sps:$4 sm:$0xff]  }
 0x1ee   :  { %v3427_v49 = vadd.f32 %v1473_v47, %v305_v35  ;;  %v3431_v50 = vadd.f32 %v1645_v48, %v313_v36  ;;  %v1475_v51 = vpop.f32.mrb[3].mxu0  ;;  %v1647_v52 = vpop.f32.mrb[3].mxu1  ;;  %v1650_v55 = vmax.f32 %v3425_v41, 0.0  ;;  %v1652_v56 = vmax.f32 %v3429_v42, 0.0  ;;  %v3924_v35 = vld [vmem:[#allocation7 + $0x2ec] ss:$16 sps:$4 sm:$0xff]  }
 0x1ef   :  { %v3428_v53 = vadd.f32 %v1475_v51, %v309_v37  ;;  %v3432_v54 = vadd.f32 %v1647_v52, %v317_v38  ;;  %v1651_v59 = vmax.f32 %v3426_v45, 0.0  ;;  %v1653_v60 = vmax.f32 %v3430_v46, 0.0  ;;  %v3919_v36 = vld [vmem:[#allocation7 + $0x2e0] ss:$16 sps:$4 sm:$0xff]   ;;  %v3922_v37 = vld [vmem:[#allocation7 + $0x2e8] ss:$16 sps:$4 sm:$0xff]  }
 0x1f0   :  { %v1654_v57 = vmax.f32 %v3427_v49, 0.0  ;;  %v1656_v58 = vmax.f32 %v3431_v50, 0.0  ;;  %v3927_v38 = vld [vmem:[#allocation7 + $0x304] ss:$16 sps:$4 sm:$0xff]   ;;  %v3928_v41 = vld [vmem:[#allocation7 + $0x308] ss:$16 sps:$4 sm:$0xff]  }
 0x1f1   :  { %v1655_v61 = vmax.f32 %v3428_v53, 0.0  ;;  %v1657_v62 = vmax.f32 %v3432_v54, 0.0  ;;  %v3933_v42 = vld [vmem:[#allocation7 + $0x324] ss:$16 sps:$4 sm:$0xff]   ;;  %v3934_v45 = vld [vmem:[#allocation7 + $0x328] ss:$16 sps:$4 sm:$0xff]  }
 0x1f2   :  { %v1658_v63 = vpack.c.bf16 %v1654_v57, %v1650_v55  ;;  %v4265_v0 = vpack.c.bf16 %v1656_v58, %v1652_v56  ;;  %v3939_v46 = vld [vmem:[#allocation7 + $0x344] ss:$16 sps:$4 sm:$0xff]   ;;  %v3942_v47 = vld [vmem:[#allocation7 + $0x34c] ss:$16 sps:$4 sm:$0xff]   ;;  %v3937_v48 = vld [vmem:[#allocation7 + $0x340] ss:$16 sps:$4 sm:$0xff]  }
 0x1f3   :  { %v1659_v1 = vpack.c.bf16 %v1655_v61, %v1651_v59  ;;  %v1661_v2 = vpack.c.bf16 %v1657_v62, %v1653_v60  ;;  %v3940_v49 = vld [vmem:[#allocation7 + $0x348] ss:$16 sps:$4 sm:$0xff]   ;;  %v3945_v50 = vld [vmem:[#allocation7 + $0x364] ss:$16 sps:$4 sm:$0xff]   ;;  %v3948_v51 = vld [vmem:[#allocation7 + $0x36c] ss:$16 sps:$4 sm:$0xff]  }
 0x1f4   :  { %v3943_v52 = vld [vmem:[#allocation7 + $0x360] ss:$16 sps:$4 sm:$0xff]   ;;  %v3946_v53 = vld [vmem:[#allocation7 + $0x368] ss:$16 sps:$4 sm:$0xff]   ;;  %v3951_v54 = vld [vmem:[#allocation7 + $0x384] ss:$16 sps:$4 sm:$0xff]  }
 0x1f5   :  { %2484 = vmatprep.mubr.bf16.mxu0 %v1659_v1  ;;  %2570 = vmatprep.mubr.bf16.mxu1 %v1659_v1  ;;  %v3954_v55 = vld [vmem:[#allocation7 + $0x38c] ss:$16 sps:$4 sm:$0xff]   ;;  %v3949_v56 = vld [vmem:[#allocation7 + $0x380] ss:$16 sps:$4 sm:$0xff]   ;;  %v3952_v57 = vld [vmem:[#allocation7 + $0x388] ss:$16 sps:$4 sm:$0xff]  }
 0x1f6   :  { %2485 = vmatmul.mubr.bf16.vlgmr.msra.gmra.mrb[4].mxu0 %v1658_v63  ;;  %2571 = vmatmul.mubr.bf16.vlgmr.msra.gmra.mrb[4].mxu1 %v1658_v63  ;;  %v3957_v58 = vld [vmem:[#allocation7 + $0x3a4] ss:$16 sps:$4 sm:$0xff]   ;;  %v3960_v59 = vld [vmem:[#allocation7 + $0x3ac] ss:$16 sps:$4 sm:$0xff]   ;;  %v3955_v60 = vld [vmem:[#allocation7 + $0x3a0] ss:$16 sps:$4 sm:$0xff]  }
 0x1f7   :  { %2496 = vmatpush1.bf16.msra.mxu0 %v3877_v3  ;;  %2582 = vmatpush1.bf16.msra.mxu1 %v3880_v4  ;;  %v3958_v61 = vld [vmem:[#allocation7 + $0x3a8] ss:$16 sps:$4 sm:$0xff]   ;;  %v3963_v62 = vld [vmem:[#allocation7 + $0x3c4] ss:$16 sps:$4 sm:$0xff]   ;;  %v3966_v63 = vld [vmem:[#allocation7 + $0x3cc] ss:$16 sps:$4 sm:$0xff]  }
 0x1f8   :  { %2527 = vmatprep.mubr.bf16.mxu0 %v1661_v2  ;;  %2613 = vmatprep.mubr.bf16.mxu1 %v1661_v2  ;;  %v3961_v1 = vld [vmem:[#allocation7 + $0x3c0] ss:$16 sps:$4 sm:$0xff]   ;;  %v3964_v2 = vld [vmem:[#allocation7 + $0x3c8] ss:$16 sps:$4 sm:$0xff]   ;;  %v3969_v3 = vld [vmem:[#allocation7 + $0x3e4] ss:$16 sps:$4 sm:$0xff]  }
 0x1f9   :  { %2497 = vmatprep.subr.bf16.mxu0 %v3885_v5  ;;  %2583 = vmatprep.subr.bf16.mxu1 %v3888_v6  ;;  %v3972_v4 = vld [vmem:[#allocation7 + $0x3ec] ss:$16 sps:$4 sm:$0xff]   ;;  %v3967_v5 = vld [vmem:[#allocation7 + $0x3e0] ss:$16 sps:$4 sm:$0xff]   ;;  %v3970_v6 = vld [vmem:[#allocation7 + $0x3e8] ss:$16 sps:$4 sm:$0xff]  }
 0x1fb   :  { %2498 = vmatpush1.bf16.msra.mxu0 %v3883_v7  ;;  %2584 = vmatpush1.bf16.msra.mxu1 %v3886_v8  ;;  %v3973_v7 = vld [vmem:[#allocation8 + $0x40] sm:$0xff]  }
 0x1fc   :  { %2499 = vmatprep.subr.bf16.mxu0 %v3891_v9  ;;  %2585 = vmatprep.subr.bf16.mxu1 %v3894_v10  ;;  %v3974_v8 = vld [vmem:[#allocation8 + $0xc0] sm:$0xff]  }
 0x1fd   :  { %v3975_v9 = vld [vmem:[#allocation8] sm:$0xff]  }
 0x1fe   :  { %v3976_v10 = vld [vmem:[#allocation8 + $0x80] sm:$0xff]  }
 0x1ff   :  { %2500 = vmatpush1.bf16.msra.mxu0 %v3889_v11  ;;  %2586 = vmatpush1.bf16.msra.mxu1 %v3892_v12  ;;  %v3977_v11 = vld [vmem:[#allocation8 + $0x48] sm:$0xff]  }
 0x200   :  { %2501 = vmatprep.subr.bf16.mxu0 %v3897_v13  ;;  %2587 = vmatprep.subr.bf16.mxu1 %v3900_v14  ;;  %v3978_v12 = vld [vmem:[#allocation8 + $0xc8] sm:$0xff]  }
 0x201   :  { %v3979_v13 = vld [vmem:[#allocation8 + $0x8] sm:$0xff]  }
 0x202   :  { %v3980_v14 = vld [vmem:[#allocation8 + $0x88] sm:$0xff]  }
 0x203   :  { %2502 = vmatpush1.bf16.msra.mxu0 %v3895_v15  ;;  %2588 = vmatpush1.bf16.msra.mxu1 %v3898_v16  ;;  %v3981_v15 = vld [vmem:[#allocation8 + $0x50] sm:$0xff]  }
 0x204   :  { %2503 = vmatprep.subr.bf16.mxu0 %v3903_v17  ;;  %2589 = vmatprep.subr.bf16.mxu1 %v3906_v18  ;;  %v3982_v16 = vld [vmem:[#allocation8 + $0xd0] sm:$0xff]  }
 0x205   :  { %v3983_v17 = vld [vmem:[#allocation8 + $0x10] sm:$0xff]  }
 0x206   :  { %v3984_v18 = vld [vmem:[#allocation8 + $0x90] sm:$0xff]  }
 0x207   :  { %2504 = vmatpush1.bf16.msra.mxu0 %v3901_v19  ;;  %2590 = vmatpush1.bf16.msra.mxu1 %v3904_v20  ;;  %v3985_v19 = vld [vmem:[#allocation8 + $0x58] sm:$0xff]  }
 0x208   :  { %2505 = vmatprep.subr.bf16.mxu0 %v3909_v21  ;;  %2591 = vmatprep.subr.bf16.mxu1 %v3912_v22  ;;  %v3986_v20 = vld [vmem:[#allocation8 + $0xd8] sm:$0xff]   ;;  %v3989_v22 = vld [vmem:[#allocation8 + $0x60] sm:$0xff]  }
 0x209   :  { %v3987_v21 = vld [vmem:[#allocation8 + $0x18] sm:$0xff]  }
 0x20b   :  { %2506 = vmatpush1.bf16.msra.mxu0 %v3907_v23  ;;  %2592 = vmatpush1.bf16.msra.mxu1 %v3910_v24  ;;  %v3990_v23 = vld [vmem:[#allocation8 + $0xe0] sm:$0xff]  }
 0x20c   :  { %2507 = vmatprep.subr.bf16.mxu0 %v3915_v25  ;;  %2593 = vmatprep.subr.bf16.mxu1 %v3918_v26  ;;  %v3991_v24 = vld [vmem:[#allocation8 + $0x20] sm:$0xff]   ;;  %v3993_v26 = vld [vmem:[#allocation8 + $0x68] sm:$0xff]  }
 0x20d   :  { %v3992_v25 = vld [vmem:[#allocation8 + $0xa0] sm:$0xff]  }
 0x20f   :  { %2508 = vmatpush1.bf16.msra.mxu0 %v3913_v27  ;;  %2594 = vmatpush1.bf16.msra.mxu1 %v3916_v28  ;;  %v3994_v27 = vld [vmem:[#allocation8 + $0xe8] sm:$0xff]  }
 0x210   :  { %2509 = vmatprep.subr.bf16.mxu0 %v3921_v32  ;;  %2595 = vmatprep.subr.bf16.mxu1 %v3924_v35  ;;  %v3995_v28 = vld [vmem:[#allocation8 + $0x28] sm:$0xff]   ;;  %v3997_v35 = vld [vmem:[#allocation8 + $0x70] sm:$0xff]  }
 0x211   :  { %v3996_v32 = vld [vmem:[#allocation8 + $0xa8] sm:$0xff]  }
 0x213   :  { %2510 = vmatpush1.bf16.msra.mxu0 %v3919_v36  ;;  %2596 = vmatpush1.bf16.msra.mxu1 %v3922_v37  ;;  %v3998_v36 = vld [vmem:[#allocation8 + $0xf0] sm:$0xff]  }
 0x214   :  { %2511 = vmatprep.subr.bf16.mxu0 %v3927_v38  ;;  %2597 = vmatprep.subr.bf16.mxu1 %v3930_v39  ;;  %v3999_v37 = vld [vmem:[#allocation8 + $0x30] sm:$0xff]   ;;  %v4001_v39 = vld [vmem:[#allocation8 + $0x78] sm:$0xff]  }
 0x215   :  { %v4000_v38 = vld [vmem:[#allocation8 + $0xb0] sm:$0xff]  }
 0x217   :  { %2512 = vmatpush1.bf16.msra.mxu0 %v3925_v40  ;;  %2598 = vmatpush1.bf16.msra.mxu1 %v3928_v41  ;;  %v4002_v40 = vld [vmem:[#allocation8 + $0xf8] sm:$0xff]  }
 0x218   :  { %2513 = vmatprep.subr.bf16.mxu0 %v3933_v42  ;;  %2599 = vmatprep.subr.bf16.mxu1 %v3936_v43  ;;  %v4003_v41 = vld [vmem:[#allocation8 + $0x38] sm:$0xff]   ;;  %v1790_v43 = vld [vmem:[%s4299_s4] sm:$0xf] }
 0x219   :  { %v4004_v42 = vld [vmem:[#allocation8 + $0xb8] sm:$0xff]  }
 0x21b   :  { %2514 = vmatpush1.bf16.msra.mxu0 %v3931_v44  ;;  %2600 = vmatpush1.bf16.msra.mxu1 %v3934_v45  ;;  %v1795_v44 = vrot.slane %v1790_v43, %v304_v30  ;;  %v1803_v45 = vrot.slane %v1790_v43, %v312_v31 }
 0x21c   :  { %2515 = vmatprep.subr.bf16.mxu0 %v3939_v46  ;;  %2601 = vmatprep.subr.bf16.mxu1 %v3942_v47  ;;  %v1799_v46 = vrot.slane %v1790_v43, %v308_v33  ;;  %v1807_v47 = vrot.slane %v1790_v43, %v316_v34 }
 0x21f   :  { %2516 = vmatpush1.bf16.msra.mxu0 %v3937_v48  ;;  %2602 = vmatpush1.bf16.msra.mxu1 %v3940_v49 }
 0x220   :  { %2517 = vmatprep.subr.bf16.mxu0 %v3945_v50  ;;  %2603 = vmatprep.subr.bf16.mxu1 %v3948_v51 }
 0x223   :  { %2518 = vmatpush1.bf16.msra.mxu0 %v3943_v52  ;;  %2604 = vmatpush1.bf16.msra.mxu1 %v3946_v53 }
 0x224   :  { %2519 = vmatprep.subr.bf16.mxu0 %v3951_v54  ;;  %2605 = vmatprep.subr.bf16.mxu1 %v3954_v55 }
 0x227   :  { %2520 = vmatpush1.bf16.msra.mxu0 %v3949_v56  ;;  %2606 = vmatpush1.bf16.msra.mxu1 %v3952_v57 }
 0x228   :  { %2521 = vmatprep.subr.bf16.mxu0 %v3957_v58  ;;  %2607 = vmatprep.subr.bf16.mxu1 %v3960_v59 }
 0x22b   :  { %2522 = vmatpush1.bf16.msra.mxu0 %v3955_v60  ;;  %2608 = vmatpush1.bf16.msra.mxu1 %v3958_v61 }
 0x22c   :  { %2523 = vmatprep.subr.bf16.mxu0 %v3963_v62  ;;  %2609 = vmatprep.subr.bf16.mxu1 %v3966_v63 }
 0x22f   :  { %2524 = vmatpush1.bf16.msra.mxu0 %v3961_v1  ;;  %2610 = vmatpush1.bf16.msra.mxu1 %v3964_v2 }
 0x230   :  { %2525 = vmatprep.subr.bf16.mxu0 %v3969_v3  ;;  %2611 = vmatprep.subr.bf16.mxu1 %v3972_v4 }
 0x233   :  { %2526 = vmatpush1.bf16.msra.mxu0 %v3967_v5  ;;  %2612 = vmatpush1.bf16.msra.mxu1 %v3970_v6 }
 0x234   :  { %3381 = vmatprep.subr.bf16.mxu0 %v3973_v7  ;;  %3403 = vmatprep.subr.bf16.mxu1 %v3974_v8 }
 0x236   :  { %2528 = vmatmul.mubr.bf16.vlgmr.msra.gmra.mrb[4].mxu0 %v4265_v0  ;;  %2614 = vmatmul.mubr.bf16.vlgmr.msra.gmra.mrb[4].mxu1 %v4265_v0  ;;  %v3988_v0 = vld [vmem:[#allocation8 + $0x98] sm:$0xff]  }
 0x237   :  { %3382 = vmatpush3.bf16.msra.mxu0 %v3975_v9  ;;  %3404 = vmatpush3.bf16.msra.mxu1 %v3976_v10  ;;  %v3348_v10 = vld [vmem:[%s4301_s6] ss:$0 sm:$0xff]  ;;  %s4142_s6 = smov [#allocation10]  }
 0x238   :  { %3383 = vmatprep.subr.bf16.mxu0 %v3977_v11  ;;  %3405 = vmatprep.subr.bf16.mxu1 %v3978_v12  ;;  %s3008_s8 = sshll.u32 %s4142_s6, 4  ;;  %s3009_s8 = int_to_ptr.vmem [resolvable:$true] %s3008_s8 }
 0x239   :  { %s4101_s9 = scalar_lea.vmem %s3009_s8, 256  ;;  %p4106_p5 = scmp.lt.s32.totalorder %s3009_s8, %s3009_s8 }
 0x23a   :  { %p4102_p4 = scmp.ne.s32.totalorder %s3009_s8, %s4101_s9  ;;  %p4107_p6 = scmp.lt.s32.totalorder %s4101_s9, %s4101_s9 }
 0x23b   :  { %3384 = vmatpush3.bf16.msra.mxu0 %v3979_v13  ;;  %3406 = vmatpush3.bf16.msra.mxu1 %v3980_v14 }
 0x23c   :  { %3385 = vmatprep.subr.bf16.mxu0 %v3981_v15  ;;  %3407 = vmatprep.subr.bf16.mxu1 %v3982_v16  ;;  %p4108_p7 = por %p4107_p6, %p4106_p5 }
 0x23e   :  { %p4109_p8 = pnand %p4108_p7, %p4102_p4 }
 0x23f   :  { %3386 = vmatpush3.bf16.msra.mxu0 %v3983_v17  ;;  %3408 = vmatpush3.bf16.msra.mxu1 %v3984_v18 }
 0x240   :  { %3387 = vmatprep.subr.bf16.mxu0 %v3985_v19  ;;  %3409 = vmatprep.subr.bf16.mxu1 %v3986_v20 }
 0x243   :  { %3388 = vmatpush3.bf16.msra.mxu0 %v3987_v21  ;;  %3410 = vmatpush3.bf16.msra.mxu1 %v3988_v0 }
 0x244   :  { %3389 = vmatprep.subr.bf16.mxu0 %v3989_v22  ;;  %3411 = vmatprep.subr.bf16.mxu1 %v3990_v23 }
 0x247   :  { %3390 = vmatpush3.bf16.msra.mxu0 %v3991_v24  ;;  %3412 = vmatpush3.bf16.msra.mxu1 %v3992_v25 }
 0x248   :  { %3391 = vmatprep.subr.bf16.mxu0 %v3993_v26  ;;  %3413 = vmatprep.subr.bf16.mxu1 %v3994_v27 }
 0x24b   :  { %3392 = vmatpush3.bf16.msra.mxu0 %v3995_v28  ;;  %3414 = vmatpush3.bf16.msra.mxu1 %v3996_v32 }
 0x24c   :  { %3393 = vmatprep.subr.bf16.mxu0 %v3997_v35  ;;  %3415 = vmatprep.subr.bf16.mxu1 %v3998_v36 }
 0x24f   :  { %3394 = vmatpush3.bf16.msra.mxu0 %v3999_v37  ;;  %3416 = vmatpush3.bf16.msra.mxu1 %v4000_v38 }
 0x250   :  { %3395 = vmatprep.subr.bf16.mxu0 %v4001_v39  ;;  %3417 = vmatprep.subr.bf16.mxu1 %v4002_v40 }
 0x253   :  { %3396 = vmatpush3.bf16.msra.mxu0 %v4003_v41  ;;  %3418 = vmatpush3.bf16.msra.mxu1 %v4004_v42 }
 0x309   :  { %v2529_v48 = vpop.f32.mrb[4].mxu0  ;;  %v2615_v49 = vpop.f32.mrb[4].mxu1 }
 0x30a   :  { %v3433_v50 = vadd.f32 %v2529_v48, %v1795_v44  ;;  %v3437_v51 = vadd.f32 %v2615_v49, %v1803_v45  ;;  %v2531_v52 = vpop.f32.mrb[5].mxu0  ;;  %v2617_v53 = vpop.f32.mrb[5].mxu1 }
 0x30b   :  { %v3434_v54 = vadd.f32 %v2531_v52, %v1799_v46  ;;  %v3438_v55 = vadd.f32 %v2617_v53, %v1807_v47  ;;  %v2533_v56 = vpop.f32.mrb[6].mxu0  ;;  %v2619_v57 = vpop.f32.mrb[6].mxu1 }
 0x30c   :  { %v3435_v30 = vadd.f32 %v2533_v56, %v1795_v44  ;;  %v3439_v58 = vadd.f32 %v2619_v57, %v1803_v45  ;;  %v2535_v59 = vpop.f32.mrb[7].mxu0  ;;  %v2621_v31 = vpop.f32.mrb[7].mxu1  ;;  %v2624_v33 = vmax.f32 %v3433_v50, 0.0  ;;  %v2626_v62 = vmax.f32 %v3437_v51, 0.0 }
 0x30d   :  { %v3436_v60 = vadd.f32 %v2535_v59, %v1799_v46  ;;  %v3440_v61 = vadd.f32 %v2621_v31, %v1807_v47  ;;  %v2625_v63 = vmax.f32 %v3434_v54, 0.0  ;;  %v2627_v1 = vmax.f32 %v3438_v55, 0.0 }
 0x30e   :  { %v2628_v29 = vmax.f32 %v3435_v30, 0.0  ;;  %v2630_v34 = vmax.f32 %v3439_v58, 0.0 }
 0x30f   :  { %v2629_v2 = vmax.f32 %v3436_v60, 0.0  ;;  %v2631_v3 = vmax.f32 %v3440_v61, 0.0 }
 0x310   :  { %v2632_v4 = vpack.c.bf16 %v2628_v29, %v2624_v33  ;;  %v2634_v5 = vpack.c.bf16 %v2630_v34, %v2626_v62 }
 0x311   :  { %v2633_v6 = vpack.c.bf16 %v2629_v2, %v2625_v63  ;;  %v2635_v7 = vpack.c.bf16 %v2631_v3, %v2627_v1 }
 0x313   :  { %2931 = vmatprep.mubr.bf16.mxu0 %v2633_v6  ;;  %2972 = vmatprep.mubr.bf16.mxu1 %v2635_v7 }
 0x314   :  { %2932 = vmatmul.mubr.bf16.vlgmr.msra.gmra.mrb[8].mxu0 %v2632_v4  ;;  %2973 = vmatmul.mubr.bf16.vlgmr.msra.gmra.mrb[8].mxu1 %v2634_v5 }
 0x3e7   :  { %v3397_v8 = vpop.f32.mrb[8].mxu0  ;;  %v3419_v9 = vpop.f32.mrb[8].mxu1 }
 0x3e8   :  { %v3398_v11 = vpop.f32.mrb[9].mxu0  ;;  %v3420_v12 = vpop.f32.mrb[9].mxu1 }
 0x3e9   :  { %v3399_v13 = vadd.f32 %v3398_v11, %v3397_v8  ;;  %v3421_v14 = vadd.f32 %v3420_v12, %v3419_v9  ;;  %v3400_v15 = vpop.f32.mrb[10].mxu0  ;;  %v3422_v16 = vpop.f32.mrb[10].mxu1 }
 0x3ea   :  { %v3401_v17 = vpop.f32.mrb[11].mxu0  ;;  %v3423_v18 = vpop.f32.mrb[11].mxu1 }
 0x3eb   :  { %v2934_v19 = vadd.f32 %v3399_v13, %v3348_v10  ;;  %v3402_v20 = vadd.f32 %v3401_v17, %v3400_v15  ;;  %v3424_v21 = vadd.f32 %v3423_v18, %v3422_v16 }
 0x3ed   :  { %v2937_v0 = vadd.f32 %v3402_v20, %v3348_v10  ;;  %v2975_v22 = vadd.f32 %v3421_v14, %v2934_v19 }
 0x3ef   :  { %2981 = vmax.xlane.f32.xlu0 %v2975_v22  ;;  %v2978_v23 = vadd.f32 %v3424_v21, %v2937_v0 }
 0x3f3   :  { %2983 = vmax.xlane.f32.xlu0 %v2978_v23 }
 0x47c   :  { %v2982_v24 = vpop.xlane.xlu0 %2981 }
 0x47d   :  { %v2985_v25 = vsub.f32 %v2975_v22, %v2982_v24 }
 0x47f   :  { %v2987_v26 = vmul.f32 1.442695, %v2985_v25 }
 0x480   :  { %v2984_v27 = vpop.xlane.xlu0 %2983 }
 0x481   :  { %v2986_v28 = vsub.f32 %v2978_v23, %v2984_v27  ;;  %4005 = vpow2.f32 %v2987_v26 }
 0x483   :  { %v2989_v32 = vmul.f32 1.442695, %v2986_v28 }
 0x485   :  { %4007 = vpow2.f32 %v2989_v32 }
 0x48b   :  { %v4006_v35 = vpop.eup %4005 }
 0x48c   :  { %2991 = vadd.xlane.f32.xlu1 %v4006_v35 }
 0x48f   :  { %v4008_v36 = vpop.eup %4007 }
 0x490   :  { %2993 = vadd.xlane.f32.xlu1 %v4008_v36 }
 0x519   :  { %v2992_v37 = vpop.xlane.xlu1 %2991 }
 0x51a   :  { %4009 = vlog2.f32 %v2992_v37 }
 0x51d   :  { %v2994_v38 = vpop.xlane.xlu1 %2993 }
 0x51e   :  { %4011 = vlog2.f32 %v2994_v38 }
 0x524   :  { %v4010_v39 = vpop.eup %4009 }
 0x525   :  { %v2996_v40 = vmul.f32 0.6931472, %v4010_v39 }
 0x527   :  { %v2999_v41 = vsub.f32 %v2985_v25, %v2996_v40 }
 0x528   :  { %v4012_v42 = vpop.eup %4011 }
 0x529   :  { %3001 = vst [vmem:[#allocation10] sm:$0xff] %v2999_v41  ;;  %v2998_v43 = vmul.f32 0.6931472, %v4012_v42 }
 0x52b   :  { %v3000_v44 = vsub.f32 %v2986_v28, %v2998_v43 }
 0x52d   :  { %3002 = vst [vmem:[#allocation10 + $0x8] sm:$0xff] %v3000_v44 }
 0x52e   :  { %4112 = shalt.err (!%p4109_p8)
}
 0x52f   :  { %s4113_s14 = scalar_lea.hbm %s4302_s7, 256 }
 0x530   :  { %p4114_p9 = scmp.ne.s32.totalorder %s4302_s7, %s4113_s14  ;;  %p4117_p10 = scmp.lt.u32.totalorder %s4113_s14, %s4302_s7 }
 0x532   :  { %p4119_p11 = pnand %p4117_p10, %p4114_p9 }
 0x534   :  { %4122 = shalt.err (!%p4119_p11)
}
 0x535   :  { %s4143_s16 = smov 128   ;;  %s4144_s19 = smov 8  }
 0x536   :  { %3014 = dma.vmem_to_hbm [thread:$0]  %s3009_s8, 256, %s4302_s7, [#allocation4], %s4143_s16, %s4143_s16, %s4144_s19  }
 0x537   :  { %4129 = dma.done.wait [#allocation4], 256  }
 0x538   :  { %4130 = vsyncadd [#allocation4], 4294967040 }
 0x539   :  { %3018 = vsyncpa [#allocation3], 1 }
 0x53a   :  { %3019 = vsyncpa [#allocation6], 1 }
 0x53b   :  { %3020 = vsyncpa [#allocation9], 1 }
 0x53c   :  { %3021 = vsyncpa [#allocation4], 1 }

</bundles_post_ra>
